<compile_context>
chip_gen: v6e
topology: v6e:2x2x1
jax: 0.10.0
libtpu: 0.0.40
codegen_flags: <defaults>
</compile_context>

<pallas_src>
import functools

import jax
import jax.numpy as jnp
from jax import lax
from jax.experimental import pallas as pl
from jax.experimental.pallas import tpu as pltpu


def _attention_kernel(x_ref, wq_ref, wkv_ref, wproj_ref, bias_ref, o_ref,
                      k_scr, v_scr, *, num_heads, compute_dtype):
    """Grid = (batch, query_tile).

    q-tile 0 of each batch element projects K/V for the whole sequence into
    VMEM scratch (head-major); every q-tile then projects its own q rows,
    runs head-batched attention against the resident K/V and applies the
    output projection + bias before storing its (TQ, C) output slab.
    """
    _, N, C = x_ref.shape
    TQ = o_ref.shape[1]
    H = num_heads
    hd = C // H
    qt = pl.program_id(1)
    f32 = jnp.float32
    exact_softmax = jnp.dtype(compute_dtype) == jnp.dtype(jnp.float32)

    # ---- K/V projection once per batch element (kept in VMEM scratch) -----
    @pl.when(qt == 0)
    def _():
        xf = x_ref[0].astype(compute_dtype)                      # (N, C)
        kv = jnp.dot(xf, wkv_ref[...],
                     preferred_element_type=f32)                 # (N, 2C)
        kv = kv.astype(compute_dtype)                            # single cast
        k = kv[:, :C].reshape(N, H, hd)
        v = kv[:, C:].reshape(N, H, hd)
        k_scr[...] = jnp.swapaxes(k, 0, 1)                       # (H, N, hd)
        v_scr[...] = jnp.swapaxes(v, 0, 1)                       # (H, N, hd)

    # ---- q projection for this q-tile (softmax scale folded into Wq) ------
    row0 = pl.multiple_of(qt * TQ, TQ)
    xq = x_ref[0, pl.ds(row0, TQ), :].astype(compute_dtype)      # (TQ, C)
    q = jnp.dot(xq, wq_ref[...], preferred_element_type=f32)     # (TQ, C)
    q = q.astype(compute_dtype).reshape(TQ, H, hd)
    q = jnp.swapaxes(q, 0, 1)                                    # (H, TQ, hd)

    # ---- head-batched scores + softmax -------------------------------------
    s = jnp.einsum('hqd,hkd->hqk', q, k_scr[...],
                   preferred_element_type=f32)                   # (H, TQ, N)
    s = s - jnp.max(s, axis=-1, keepdims=True)
    p = jnp.exp(s)
    denom = jnp.sum(p, axis=-1, keepdims=True)
    if exact_softmax:
        p = p / denom                                            # tight-check path
    else:
        p = p * pl.reciprocal(denom, approx=True)                # EUP slot

    # ---- weighted values, head concat, output projection -------------------
    o = jnp.einsum('hqk,hkd->hqd', p.astype(compute_dtype), v_scr[...],
                   preferred_element_type=f32)                   # (H, TQ, hd)
    o = jnp.swapaxes(o, 0, 1).reshape(TQ, C).astype(compute_dtype)
    out = jnp.dot(o, wproj_ref[...], preferred_element_type=f32)  # (TQ, C)
    out = out + bias_ref[...]                                     # bias (1, C) f32
    o_ref[0] = out.astype(o_ref.dtype)


@functools.partial(jax.jit,
                   static_argnames=("num_heads", "compute_dtype", "q_tile"))
def attention_forward(x, w_qkv, w_proj, b_proj, *, num_heads,
                      compute_dtype=jnp.bfloat16, q_tile=256):
    """x: (B, N, C) f32; w_qkv: (3C, C) PyTorch (out,in); w_proj: (C, C);
    b_proj: (C,).  compute_dtype is the MXU operand dtype (accumulation and
    softmax stay float32)."""
    B, N, C = x.shape
    assert C % num_heads == 0, "num_heads must divide C"
    hd = C // num_heads
    scale = hd ** (-0.5)

    tq = min(q_tile, N)
    if N % tq != 0:          # keep the demo simple; production: pad / mask
        tq = N
    n_q_tiles = N // tq

    # Weight glue (constant-folded by jit): PyTorch (out,in) -> (in,out),
    # softmax scale folded into Wq, cast to the MXU compute dtype.
    wq_t = (w_qkv[:C, :].T * scale).astype(compute_dtype)      # (C, C)
    wkv_t = w_qkv[C:, :].T.astype(compute_dtype)               # (C, 2C)
    wproj_t = w_proj.T.astype(compute_dtype)                   # (C, C)
    bias = b_proj.reshape(1, C).astype(jnp.float32)            # (1, C)

    kernel = functools.partial(_attention_kernel, num_heads=num_heads,
                               compute_dtype=compute_dtype)

    cd = jnp.dtype(compute_dtype).itemsize
    xb = jnp.dtype(x.dtype).itemsize
    cost = pl.CostEstimate(
        flops=(2 * B * N * C * (3 * C)                  # QKV projection
               + 4 * B * num_heads * N * N * hd         # scores + p@v
               + 2 * B * N * C * C),                    # output projection
        transcendentals=B * num_heads * N * N,          # exp
        bytes_accessed=(B * N * C * xb                  # x read
                        + B * N * C * xb                # output write
                        + 4 * C * C * cd + C * 4),      # weights + bias
    )

    # Per-step VMEM footprint (x block + weights double-buffered + K/V
    # scratch + f32 intermediates), with 2x headroom, clamped to [32, 64] MiB
    # so it is valid on v5e/v6e (128 MiB) and v7x (64 MiB).
    vmem_est = (2 * N * C * xb                      # x block (dbl-buffered)
                + 2 * 4 * C * C * cd                # Wq + Wkv + Wproj
                + 2 * tq * C * xb                   # output block
                + 2 * N * C * cd                    # K/V scratch
                + N * 2 * C * 4                     # kv f32 intermediate
                + 2 * num_heads * tq * N * 4        # scores + probs f32
                + 4 * tq * C * 4)                   # q / concat / out f32
    vmem_limit = int(min(max(2 * vmem_est, 32 * 1024 * 1024),
                         64 * 1024 * 1024))

    return pl.pallas_call(
        kernel,
        out_shape=jax.ShapeDtypeStruct((B, N, C), x.dtype),
        grid_spec=pltpu.PrefetchScalarGridSpec(
            num_scalar_prefetch=0,
            grid=(B, n_q_tiles),
            in_specs=[
                pl.BlockSpec((1, N, C), lambda b, q: (b, 0, 0)),     # x (f32)
                pl.BlockSpec((C, C), lambda b, q: (0, 0)),           # Wq*scale
                pl.BlockSpec((C, 2 * C), lambda b, q: (0, 0)),       # Wkv
                pl.BlockSpec((C, C), lambda b, q: (0, 0)),           # Wproj
                pl.BlockSpec((1, C), lambda b, q: (0, 0)),           # bias
            ],
            out_specs=pl.BlockSpec((1, tq, C), lambda b, q: (b, q, 0)),
            scratch_shapes=[
                pltpu.VMEM((num_heads, N, hd), compute_dtype),       # K
                pltpu.VMEM((num_heads, N, hd), compute_dtype),       # V
            ],
        ),
        compiler_params=pltpu.CompilerParams(
            dimension_semantics=("parallel", "arbitrary"),
            vmem_limit_bytes=vmem_limit),
        cost_estimate=cost,
    )(x, wq_t, wkv_t, wproj_t, bias)


def attention_reference(x, w_qkv, w_proj, b_proj, num_heads):
    """Plain-JAX re-implementation of the PyTorch forward (eval mode)."""
    B, N, C = x.shape
    hd = C // num_heads
    scale = hd ** (-0.5)
    qkv = x @ w_qkv.T                                     # (B, N, 3C)
    qkv = qkv.reshape(B, N, 3, num_heads, hd).transpose(2, 0, 3, 1, 4)
    q, k, v = qkv[0], qkv[1], qkv[2]                      # (B, H, N, hd)
    q = q * scale
    attn = jnp.einsum('bhnd,bhmd->bhnm', q, k)
    attn = jax.nn.softmax(attn, axis=-1)
    out = jnp.einsum('bhnm,bhmd->bhnd', attn, v)
    out = out.transpose(0, 2, 1, 3).reshape(B, N, C)
    return out @ w_proj.T + b_proj


if __name__ == "__main__":
    B, N, C, H = 2, 16, 64, 8

    key = jax.random.PRNGKey(0)
    kx, kqkv, kproj, kb = jax.random.split(key, 4)

    x = jax.random.normal(kx, (B, N, C), dtype=jnp.float32)
    w_qkv = jax.random.normal(kqkv, (3 * C, C), dtype=jnp.float32) * (1.0 / C) ** 0.5
    w_proj = jax.random.normal(kproj, (C, C), dtype=jnp.float32) * (1.0 / C) ** 0.5
    b_proj = jax.random.normal(kb, (C,), dtype=jnp.float32) * 0.1

    ref = attention_reference(x, w_qkv, w_proj, b_proj, H)

    # float32-compute path with exact softmax normalization; q_tile=8 also
    # exercises the multi-q-tile grid + resident K/V scratch path.
    out_f32 = jax.block_until_ready(
        attention_forward(x, w_qkv, w_proj, b_proj, num_heads=H,
                          compute_dtype=jnp.float32, q_tile=8))
    assert out_f32.shape == (B, N, C)
    err_f32 = float(jnp.max(jnp.abs(out_f32 - ref)))
    assert jnp.allclose(out_f32, ref, atol=1e-2, rtol=1e-2), err_f32

    # bf16 MXU-operand fast path (f32 accumulation / softmax): looser
    # tolerance for operand rounding.
    out_bf16 = jax.block_until_ready(
        attention_forward(x, w_qkv, w_proj, b_proj, num_heads=H))
    assert out_bf16.shape == (B, N, C)
    err_bf16 = float(jnp.max(jnp.abs(out_bf16 - ref)))
    assert jnp.allclose(out_bf16, ref, atol=1e-1, rtol=1e-1), err_bf16

    print("KERNEL_OK")
</pallas_src>

<mosaic_0001>
module attributes {stable_mosaic.version = 11 : i64} {
  func.func @_attention_kernel(%arg0: i32, %arg1: i32, %arg2: memref<1x16x64xf32, #tpu.memory_space<vmem>>, %arg3: memref<64x64xf32, #tpu.memory_space<vmem>>, %arg4: memref<64x128xf32, #tpu.memory_space<vmem>>, %arg5: memref<64x64xf32, #tpu.memory_space<vmem>>, %arg6: memref<1x64xf32, #tpu.memory_space<vmem>>, %arg7: memref<1x8x64xf32, #tpu.memory_space<vmem>>, %arg8: memref<8x16x8xf32, #tpu.memory_space<vmem>>, %arg9: memref<8x16x8xf32, #tpu.memory_space<vmem>>) attributes {dimension_semantics = [#tpu.dimension_semantics<parallel>, #tpu.dimension_semantics<arbitrary>], iteration_bounds = array<i64: 2, 2>, scalar_prefetch = 0 : i64, scratch_operands = 2 : i64, tpu.core_type = #tpu.core_type<tc>, window_params = [{transform_indices = @transform_0, window_bounds = array<i64: 1, 16, 64>}, {pipeline_mode = #tpu.pipeline_mode<synchronous>, transform_indices = @transform_1, window_bounds = array<i64: 64, 64>}, {pipeline_mode = #tpu.pipeline_mode<synchronous>, transform_indices = @transform_2, window_bounds = array<i64: 64, 128>}, {pipeline_mode = #tpu.pipeline_mode<synchronous>, transform_indices = @transform_3, window_bounds = array<i64: 64, 64>}, {pipeline_mode = #tpu.pipeline_mode<synchronous>, transform_indices = @transform_4, window_bounds = array<i64: 1, 64>}, {transform_indices = @transform_5, window_bounds = array<i64: 1, 8, 64>}]} {
    %c0_i32 = arith.constant 0 : i32
    %0 = arith.cmpi eq, %arg1, %c0_i32 : i32
    %1 = arith.extui %0 : i1 to i32
    %c0_i32_0 = arith.constant 0 : i32
    %2 = arith.cmpi ne, %1, %c0_i32_0 : i32
    scf.if %2 {
      %c0_22 = arith.constant 0 : index
      %c0_23 = arith.constant 0 : index
      %c0_24 = arith.constant 0 : index
      %35 = vector.load %arg2[%c0_22, %c0_23, %c0_24] : memref<1x16x64xf32, #tpu.memory_space<vmem>>, vector<1x16x64xf32>
      %36 = vector.shape_cast %35 : vector<1x16x64xf32> to vector<16x64xf32>
      %c0_25 = arith.constant 0 : index
      %c0_26 = arith.constant 0 : index
      %37 = vector.load %arg4[%c0_25, %c0_26] : memref<64x128xf32, #tpu.memory_space<vmem>>, vector<64x128xf32>
      %cst_27 = arith.constant dense<0.000000e+00> : vector<16x128xf32>
      %38 = tpu.matmul %36, %37, %cst_27 {dimension_numbers = #tpu.dot_dimension_numbers<[1], [0], [0], [1], [0, 0, 1, 1], [], []>} : vector<16x64xf32>, vector<64x128xf32>, vector<16x128xf32> -> vector<16x128xf32>
      %39 = vector.extract_strided_slice %38 {offsets = [0, 0], sizes = [16, 64], strides = [1, 1]} : vector<16x128xf32> to vector<16x64xf32>
      %40 = vector.shape_cast %39 : vector<16x64xf32> to vector<16x8x8xf32>
      %41 = vector.extract_strided_slice %38 {offsets = [0, 64], sizes = [16, 64], strides = [1, 1]} : vector<16x128xf32> to vector<16x64xf32>
      %42 = vector.shape_cast %41 : vector<16x64xf32> to vector<16x8x8xf32>
      %43 = tpu.transpose %40, [1, 0, 2] : vector<16x8x8xf32> -> vector<8x16x8xf32>
      %c0_28 = arith.constant 0 : index
      %c0_29 = arith.constant 0 : index
      %c0_30 = arith.constant 0 : index
      %44 = vector.load %arg8[%c0_28, %c0_29, %c0_30] : memref<8x16x8xf32, #tpu.memory_space<vmem>>, vector<8x16x8xf32>
      tpu.vector_store %arg8[%c0_28, %c0_29, %c0_30], %43 {strides = array<i32>} : memref<8x16x8xf32, #tpu.memory_space<vmem>>, vector<8x16x8xf32>,
      %45 = tpu.transpose %42, [1, 0, 2] : vector<16x8x8xf32> -> vector<8x16x8xf32>
      %c0_31 = arith.constant 0 : index
      %c0_32 = arith.constant 0 : index
      %c0_33 = arith.constant 0 : index
      %46 = vector.load %arg9[%c0_31, %c0_32, %c0_33] : memref<8x16x8xf32, #tpu.memory_space<vmem>>, vector<8x16x8xf32>
      tpu.vector_store %arg9[%c0_31, %c0_32, %c0_33], %45 {strides = array<i32>} : memref<8x16x8xf32, #tpu.memory_space<vmem>>, vector<8x16x8xf32>,
    } else {
    }
    %c8_i32 = arith.constant 8 : i32
    %3 = arith.muli %arg1, %c8_i32 : i32
    %4 = tpu.assume_multiple %3, 8 : i32
    %c0 = arith.constant 0 : index
    %5 = arith.index_cast %4 : i32 to index
    %c0_1 = arith.constant 0 : index
    %6 = vector.load %arg2[%c0, %5, %c0_1] : memref<1x16x64xf32, #tpu.memory_space<vmem>>, vector<1x8x64xf32>
    %7 = vector.shape_cast %6 : vector<1x8x64xf32> to vector<8x64xf32>
    %c0_2 = arith.constant 0 : index
    %c0_3 = arith.constant 0 : index
    %8 = vector.load %arg3[%c0_2, %c0_3] : memref<64x64xf32, #tpu.memory_space<vmem>>, vector<64x64xf32>
    %cst = arith.constant dense<0.000000e+00> : vector<8x64xf32>
    %9 = tpu.matmul %7, %8, %cst {dimension_numbers = #tpu.dot_dimension_numbers<[1], [0], [0], [1], [0, 0, 1, 1], [], []>} : vector<8x64xf32>, vector<64x64xf32>, vector<8x64xf32> -> vector<8x64xf32>
    %10 = vector.shape_cast %9 : vector<8x64xf32> to vector<8x8x8xf32>
    %11 = tpu.transpose %10, [1, 0, 2] : vector<8x8x8xf32> -> vector<8x8x8xf32>
    %c0_4 = arith.constant 0 : index
    %c0_5 = arith.constant 0 : index
    %c0_6 = arith.constant 0 : index
    %12 = vector.load %arg8[%c0_4, %c0_5, %c0_6] : memref<8x16x8xf32, #tpu.memory_space<vmem>>, vector<8x16x8xf32>
    "tpu.trace_start"() <{level = 10 : i32, message = "hqd,hkd->hqk"}> : () -> ()
    %cst_7 = arith.constant dense<0.000000e+00> : vector<8x8x16xf32>
    %13 = tpu.matmul %11, %12, %cst_7 {dimension_numbers = #tpu.dot_dimension_numbers<[2], [2], [1], [1], [0, 0, 0, 1, 1, 1], [0], [0]>} : vector<8x8x8xf32>, vector<8x16x8xf32>, vector<8x8x16xf32> -> vector<8x8x16xf32>
    "tpu.trace_stop"() : () -> ()
    %cst_8 = arith.constant dense<0xFF800000> : vector<8x8xf32>
    %14 = vector.multi_reduction <maximumf>, %13, %cst_8 [2] : vector<8x8x16xf32> to vector<8x8xf32>
    %15 = vector.shape_cast %14 : vector<8x8xf32> to vector<8x8x1xf32>
    %16 = vector.broadcast %15 : vector<8x8x1xf32> to vector<8x8x16xf32>
    %17 = arith.subf %13, %16 : vector<8x8x16xf32>
    %18 = math.exp %17 : vector<8x8x16xf32>
    %cst_9 = arith.constant dense<0.000000e+00> : vector<8x8xf32>
    %19 = vector.multi_reduction <add>, %18, %cst_9 [2] : vector<8x8x16xf32> to vector<8x8xf32>
    %20 = vector.shape_cast %19 : vector<8x8xf32> to vector<8x8x1xf32>
    %21 = vector.broadcast %20 : vector<8x8x1xf32> to vector<8x8x16xf32>
    %22 = arith.divf %18, %21 : vector<8x8x16xf32>
    %c0_10 = arith.constant 0 : index
    %c0_11 = arith.constant 0 : index
    %c0_12 = arith.constant 0 : index
    %23 = vector.load %arg9[%c0_10, %c0_11, %c0_12] : memref<8x16x8xf32, #tpu.memory_space<vmem>>, vector<8x16x8xf32>
    "tpu.trace_start"() <{level = 10 : i32, message = "hqk,hkd->hqd"}> : () -> ()
    %cst_13 = arith.constant dense<0.000000e+00> : vector<8x8x8xf32>
    %24 = tpu.matmul %22, %23, %cst_13 {dimension_numbers = #tpu.dot_dimension_numbers<[2], [1], [1], [2], [0, 0, 0, 1, 1, 2], [0], [0]>} : vector<8x8x16xf32>, vector<8x16x8xf32>, vector<8x8x8xf32> -> vector<8x8x8xf32>
    "tpu.trace_stop"() : () -> ()
    %25 = tpu.transpose %24, [1, 0, 2] : vector<8x8x8xf32> -> vector<8x8x8xf32>
    %26 = vector.shape_cast %25 : vector<8x8x8xf32> to vector<8x64xf32>
    %c0_14 = arith.constant 0 : index
    %c0_15 = arith.constant 0 : index
    %27 = vector.load %arg5[%c0_14, %c0_15] : memref<64x64xf32, #tpu.memory_space<vmem>>, vector<64x64xf32>
    %cst_16 = arith.constant dense<0.000000e+00> : vector<8x64xf32>
    %28 = tpu.matmul %26, %27, %cst_16 {dimension_numbers = #tpu.dot_dimension_numbers<[1], [0], [0], [1], [0, 0, 1, 1], [], []>} : vector<8x64xf32>, vector<64x64xf32>, vector<8x64xf32> -> vector<8x64xf32>
    %c0_17 = arith.constant 0 : index
    %c0_18 = arith.constant 0 : index
    %29 = vector.load %arg6[%c0_17, %c0_18] : memref<1x64xf32, #tpu.memory_space<vmem>>, vector<1x64xf32>
    %30 = vector.broadcast %29 : vector<1x64xf32> to vector<8x64xf32>
    %31 = arith.addf %28, %30 : vector<8x64xf32>
    %c0_19 = arith.constant 0 : index
    %c0_20 = arith.constant 0 : index
    %c0_21 = arith.constant 0 : index
    %32 = vector.load %arg7[%c0_19, %c0_20, %c0_21] : memref<1x8x64xf32, #tpu.memory_space<vmem>>, vector<1x8x64xf32>
    %33 = vector.shape_cast %32 : vector<1x8x64xf32> to vector<8x64xf32>
    %34 = vector.shape_cast %31 : vector<8x64xf32> to vector<1x8x64xf32>
    tpu.vector_store %arg7[%c0_19, %c0_20, %c0_21], %34 {strides = array<i32>} : memref<1x8x64xf32, #tpu.memory_space<vmem>>, vector<1x8x64xf32>,
    return
  }
  func.func @transform_0(%arg0: i32, %arg1: i32) -> (i32, i32, i32) {
    %c0_i32 = arith.constant 0 : i32
    %c0_i32_0 = arith.constant 0 : i32
    %c0_i32_1 = arith.constant 0 : i32
    return %arg0, %c0_i32, %c0_i32_0 : i32, i32, i32
  }
  func.func @transform_1(%arg0: i32, %arg1: i32) -> (i32, i32) {
    %c0_i32 = arith.constant 0 : i32
    %c0_i32_0 = arith.constant 0 : i32
    %c0_i32_1 = arith.constant 0 : i32
    return %c0_i32, %c0_i32_0 : i32, i32
  }
  func.func @transform_2(%arg0: i32, %arg1: i32) -> (i32, i32) {
    %c0_i32 = arith.constant 0 : i32
    %c0_i32_0 = arith.constant 0 : i32
    %c0_i32_1 = arith.constant 0 : i32
    return %c0_i32, %c0_i32_0 : i32, i32
  }
  func.func @transform_3(%arg0: i32, %arg1: i32) -> (i32, i32) {
    %c0_i32 = arith.constant 0 : i32
    %c0_i32_0 = arith.constant 0 : i32
    %c0_i32_1 = arith.constant 0 : i32
    return %c0_i32, %c0_i32_0 : i32, i32
  }
  func.func @transform_4(%arg0: i32, %arg1: i32) -> (i32, i32) {
    %c0_i32 = arith.constant 0 : i32
    %c0_i32_0 = arith.constant 0 : i32
    %c0_i32_1 = arith.constant 0 : i32
    return %c0_i32, %c0_i32_0 : i32, i32
  }
  func.func @transform_5(%arg0: i32, %arg1: i32) -> (i32, i32, i32) {
    %c0_i32 = arith.constant 0 : i32
    %c0_i32_0 = arith.constant 0 : i32
    return %arg0, %arg1, %c0_i32 : i32, i32, i32
  }
}

</mosaic_0001>

<bundles_post_ra>
// kernel: attention_forward.1
= control target key start
LH: loop header
LB: loop body
LE: loop exit
PB: predicated region body
PF: predicated region fallthrough
CT: control target
= control target key end

     0   :  { %10 = vsyncpa [#allocation5], 0  ;;  %s5103_s0 = inlined_call_operand.vmem [shape: f32[2,16,64], index: 0, kind: input, shape index: {}]   ;;  %s5104_s1 = inlined_call_operand.vmem [shape: f32[64,64], index: 1, kind: input, shape index: {}]   ;;  %s5105_s2 = inlined_call_operand.vmem [shape: f32[64,128], index: 2, kind: input, shape index: {}]   ;;  %s5106_s3 = inlined_call_operand.vmem [shape: f32[64,64], index: 3, kind: input, shape index: {}]   ;;  %s5107_s4 = inlined_call_operand.vmem [shape: f32[1,64], index: 4, kind: input, shape index: {}]   ;;  %s5108_s5 = inlined_call_operand.hbm [shape: f32[2,16,64], index: 5, kind: output, shape index: {}]  }
   0x1   :  { %12 = vsyncpa [#allocation5 + $0x1], 0  ;;  %s4384_s18 = smov 0   ;;  %s4386_s19 = smov 0  }
   0x2   :  { %s4388_s20 = smov 0   ;;  %s4390_s21 = smov 0  }
   0x3   :  { %s4392_s22 = smov 0   ;;  %s4394_s23 = smov 0  }
   0x4   :  { %s4396_s24 = smov 0   ;;  %s4398_s25 = smov 0  }
   0x5 LB: > { %s3754_s26 = sadd.s32 4294967295, %s4323_s25   ;;  %s3755_s27 = sadd.s32 4294967294, %s4323_s25   ;;  %s4323_s25 = sphi %s4398_s25, %s18_s25   ;;  %s4319_s24 = sphi %s4396_s24, %s5117_s24   ;;  %s4315_s23 = sphi %s4394_s23, %s5116_s23   ;;  %s4311_s22 = sphi %s4392_s22, %s5115_s22   ;;  %s4307_s21 = sphi %s4390_s21, %s5114_s21   ;;  %s4303_s20 = sphi %s4388_s20, %s5113_s20   ;;  %s4299_s19 = sphi %s4386_s19, %s5112_s19   ;;  %s4295_s18 = sphi %s4384_s18, %s5111_s18  }
   0x6   : > { %s27_s28 = sadd.s32 1, %s4315_s23  ;;  %s30_s29 = sadd.s32 1, %s4319_s24 }
   0x7   : > { %p28_p0 = scmp.ge.s32.totalorder %s27_s28, 2  ;;  %p159_p1 = scmp.ne.s32.totalorder %s4303_s20, %s4299_s19 }
   0x8   : > { %p160_p2 = scmp.eq.s32.totalorder %s3754_s26, 3  ;;  %p165_p5 = scmp.ne.s32.totalorder %s4299_s19, %s4295_s18 }
   0x9   : > { %s5119_s28 = smov (%p28_p0, %s27_s28), 0  ;;  %s5121_s29 = smov (!%p28_p0, %s30_s29), %s4319_s24 }
   0xa   : > { %s145_s30 = ssub.s32 %s4315_s23, %s5119_s28  ;;  %p4435_p3 = por %p160_p2, %p159_p1 }
   0xb   : > { %p32_p4 = scmp.ge.s32.totalorder %s5121_s29, 2  ;;  %p166_p6 = scmp.eq.s32.totalorder %s3755_s27, 3 }
   0xc   : > { %p3758_p7 = scmp.ge.s32.totalorder %s4323_s25, 1  ;;  %p204_p9 = scmp.lt.s32.totalorder %s4323_s25, 5 }
   0xd   : > { %s5123_s29 = smov (%p32_p4, %s5121_s29), 0  ;;  %p4444_p8 = por %p166_p6, %p165_p5 }
   0xe   : > { %s144_s8 = ssub.s32 %s4319_s24, %s5123_s29  ;;  %s149_s9 = sadd.s32 1, %s4303_s20 }
   0xf   : > { %s146_s10 = sor.u32 %s145_s30, %s144_s8  ;;  %p205_p10 = pnand %p3758_p7, %p204_p9 }
  0x10   : > { %p147_p11 = scmp.eq.s32.totalorder %s146_s10, 0  ;;  %s229_s12 = sand.u32 (!%p205_p10), 1, %s4299_s19  }
  0x11   : > { %208 = sbr.rel (%p205_p10) target bundleno = 1964 (0x7ac), region = 40  ;;  %p232_p12 = scmp.lt.s32.totalorder (!%p205_p10), %s4311_s22, 1 }
  0x12   : > { %s4453_s11 = scalar_select %p147_p11, %s4303_s20, %s149_s9  }
  0x13   : > { %s4459_s13 = sshll.u32 (!%p205_p10), %s229_s12, 3  ;;  %p3762_p13 = scmp.ne.s32.totalorder (!%p205_p10), %s4307_s21, 0 }
  0x14   : > { %s231_s27 = scalar_lea.vmem (!%p205_p10), [#allocation4], %s4459_s13 }
  0x16   : > { %s233_s14 = scalar_select %p232_p12, %s4311_s22, 1 }
  0x17   : > { %240 = sbr.rel (%p3762_p13) target bundleno = 532 (0x214), region = 44  ;;  %s4325_s30 = smov (!%p3762_p13), 112  }
  0x18   : > { %s3854_s15 = sshll.u32 %s233_s14, 4  ;;  %s4326_s8 = smov (!%p3762_p13), 120  }
  0x19   : > { %s4465_s26 = scalar_lea.vmem %s5103_s0, %s3854_s15  ;;  %s4327_s9 = smov (!%p3762_p13), 104  }
  0x1a   : > { %s4328_s10 = smov (!%p3762_p13), 96   ;;  %s4329_s14 = smov (!%p3762_p13), 88  }
  0x1b   : > { %s4330_s16 = smov (!%p3762_p13), 80   ;;  %s4331_s15 = smov (!%p3762_p13), 72  }
  0x1c   : > { %v250_v0 = vld [vmem:[%s5105_s2 + $0x38] sm:$0xff]  ;;  %v249_v1 = vld [vmem:[%s5105_s2 + $0x30] sm:$0xff]  ;;  %vm251_vm0 = vcmask 523264   ;;  %v248_v2 = vld [vmem:[%s5105_s2 + $0x28] sm:$0xff]  ;;  %s4332_s17 = smov 64   ;;  %v382_v14 = vlaneseq  ;;  %vm1241_vm1 = vcmask 64512  }
  0x1d   : > { %3931 = vmatprep.subr.mxu0 %v250_v0  ;;  %v241_v3 = vld [vmem:[%s4465_s26] sm:$0xff]  ;;  %v246_v5 = vld [vmem:[%s5105_s2 + $0x18] sm:$0xff]  ;;  %v245_v6 = vld [vmem:[%s5105_s2 + $0x10] sm:$0xff]  ;;  %v4333_v12 = vmov 1983009808  }
  0x1e   : > { %3932 = vmatpush3.msra.mxu0 %v250_v0  ;;  %3947 = vmatprep.mubr.msk.f32.mxu0 %vm251_vm0, %v241_v3  ;;  %v247_v4 = vld [vmem:[%s5105_s2 + $0x20] sm:$0xff]  ;;  %v244_v7 = vld [vmem:[%s5105_s2 + $0x8] sm:$0xff]  ;;  %v380_v13 = vunpack.c.l.s4 %v4333_v12  ;;  %v4334_v15 = vmov 1934713408   ;;  %v383_v18 = vshrl.u32 %v382_v14, 7 }
  0x1f   : > { %3933 = vmatprep.subr.mxu0 %v249_v1  ;;  %v243_v8 = vld [vmem:[%s5105_s2] sm:$0xff]  ;;  %v242_v9 = vld [vmem:[%s4465_s26 + $0x8] sm:$0xff]  ;;  %v444_v16 = vunpack.c.l.s4 %v4334_v15 }
  0x20   : > { %3934 = vmatpush3.msra.mxu0 %v249_v1  ;;  %v381_v17 = vunpack.c.0.s8 %v380_v13 }
  0x21   : > { %3935 = vmatprep.subr.mxu0 %v248_v2  ;;  %v445_v21 = vunpack.c.0.s8 %v444_v16 }
  0x22   : > { %3936 = vmatpush3.msra.mxu0 %v248_v2  ;;  %v4510_v22 = vsub.s32 %v381_v17, %v383_v18 }
  0x23   : > { %3937 = vmatprep.subr.mxu0 %v247_v4  ;;  %v4517_v29 = vsub.s32 %v445_v21, %v383_v18 }
  0x24   : > { %3938 = vmatpush3.msra.mxu0 %v247_v4 }
  0x25   : > { %3939 = vmatprep.subr.mxu0 %v246_v5 }
  0x26   : > { %3940 = vmatpush3.msra.mxu0 %v246_v5 }
  0x27   : > { %3941 = vmatprep.subr.mxu0 %v245_v6 }
  0x28   : > { %3942 = vmatpush3.msra.mxu0 %v245_v6 }
  0x29   : > { %3943 = vmatprep.subr.mxu0 %v244_v7 }
  0x2a   : > { %3944 = vmatpush3.msra.mxu0 %v244_v7 }
  0x2b   : > { %3945 = vmatprep.subr.mxu0 %v243_v8 }
  0x2c   : > { %3946 = vmatpush3.msra.mxu0 %v243_v8 }
  0x2d   : > { %3948 = vmatmul.mubr.msk.f32.vlgmr.msra.gmra.mxu0 %vm251_vm0, %v242_v9 }
  0xed   : > { %v3949_v10 = vpop.f32.mrf.mxu0 }
  0xee   : > { %343 = vrot.lane.b32.xlu1 %v3949_v10, %s4325_s30  ;;  %337 = vrot.lane.b32.xlu0 %v3949_v10, %s4326_s8 }
  0xef   : > { %v4497_v11 = vpop.f32.mrf.mxu0 }
  0xf2   : > { %349 = vrot.lane.b32.xlu1 %v3949_v10, %s4327_s9  ;;  %335 = vrot.lane.b32.xlu0 %v4497_v11, %s4326_s8 }
  0xf6   : > { %355 = vrot.lane.b32.xlu1 %v3949_v10, %s4328_s10  ;;  %347 = vrot.lane.b32.xlu0 %v4497_v11, %s4327_s9 }
  0xfa   : > { %361 = vrot.lane.b32.xlu1 %v3949_v10, %s4329_s14  ;;  %353 = vrot.lane.b32.xlu0 %v4497_v11, %s4328_s10 }
  0xfe   : > { %367 = vrot.lane.b32.xlu1 %v3949_v10, %s4330_s16  ;;  %359 = vrot.lane.b32.xlu0 %v4497_v11, %s4329_s14 }
 0x102   : > { %341 = vrot.lane.b32.xlu1 %v4497_v11, %s4325_s30  ;;  %365 = vrot.lane.b32.xlu0 %v4497_v11, %s4330_s16 }
 0x106   : > { %373 = vrot.lane.b32.xlu1 %v3949_v10, %s4331_s15  ;;  %371 = vrot.lane.b32.xlu0 %v4497_v11, %s4331_s15 }
 0x10a   : > { %651 = vrot.lane.b32.xlu1 %v3949_v10, %s4332_s17  ;;  %649 = vrot.lane.b32.xlu0 %v4497_v11, %s4332_s17 }
 0x160   : > { %v344_v19 = vpop.permute.xlu1 %343  ;;  %v338_v20 = vpop.permute.xlu0 %337 }
 0x161   : > { %655 = vrot.lane.b32.xlu1 %v338_v20, %s4332_s17  ;;  %v513_v23 = vcombine.low %v3949_v10, %v344_v19  ;;  %v514_v24 = vcombine.high %v3949_v10, %v344_v19 }
 0x163   : > { %v521_v30 = vrot.slane %v513_v23, %v4510_v22  ;;  %v528_v31 = vrot.slane %v514_v24, %v4510_v22 }
 0x164   : > { %v350_v25 = vpop.permute.xlu1 %349  ;;  %v4512_v26 = vpop.permute.xlu0 %335 }
 0x165   : > { %v529_v27 = vcombine.low %v338_v20, %v350_v25  ;;  %v530_v28 = vcombine.high %v338_v20, %v350_v25  ;;  %659 = vrot.lane.b32.xlu1 %v344_v19, %s4332_s17  ;;  %653 = vrot.lane.b32.xlu0 %v4512_v26, %s4332_s17 }
 0x167   : > { %v537_v32 = vrot.slane %v529_v27, %v4510_v22  ;;  %v544_v33 = vrot.slane %v530_v28, %v4510_v22 }
 0x168   : > { %v356_v34 = vpop.permute.xlu1 %355  ;;  %v4523_v35 = vpop.permute.xlu0 %347 }
 0x169   : > { %v577_v36 = vcombine.low %v521_v30, %v537_v32  ;;  %v578_v37 = vcombine.high %v521_v30, %v537_v32  ;;  %v593_v38 = vcombine.low %v528_v31, %v544_v33  ;;  %v594_v39 = vcombine.high %v528_v31, %v544_v33  ;;  %663 = vrot.lane.b32.xlu1 %v350_v25, %s4332_s17 }
 0x16a   : > { %v393_v60 = vcombine.low %v4512_v26, %v4523_v35  ;;  %v394_v61 = vcombine.high %v4512_v26, %v4523_v35 }
 0x16b   : > { %v585_v40 = vrot.slane %v577_v36, %v4517_v29  ;;  %v592_v41 = vrot.slane %v578_v37, %v4517_v29  ;;  %v601_v42 = vrot.slane %v593_v38, %v4517_v29  ;;  %v608_v43 = vrot.slane %v594_v39, %v4517_v29 }
 0x16c   : > { %v4530_v44 = vpop.permute.xlu1 %361  ;;  %v4532_v45 = vpop.permute.xlu0 %353  ;;  %v401_v15 = vrot.slane %v393_v60, %v4510_v22 }
 0x16d   : > { %v3773_v46 = vcombine.low %v585_v40, %v592_v41  ;;  %v3775_v47 = vcombine.high %v585_v40, %v592_v41  ;;  %v3777_v48 = vcombine.low %v601_v42, %v608_v43  ;;  %v3779_v49 = vcombine.high %v601_v42, %v608_v43  ;;  %667 = vrot.lane.b32.xlu1 %v356_v34, %s4332_s17 }
 0x16f   : > { %v1113_v50 = vrot.slane %v3773_v46, %v4510_v22  ;;  %v1129_v51 = vrot.slane %v3775_v47, %v4510_v22  ;;  %v1145_v52 = vrot.slane %v3777_v48, %v4510_v22  ;;  %v1161_v53 = vrot.slane %v3779_v49, %v4510_v22 }
 0x170   : > { %v368_v54 = vpop.permute.xlu1 %367  ;;  %v4539_v55 = vpop.permute.xlu0 %359 }
 0x171   : > { %v1169_v56 = vcombine.low %v1113_v50, %v1129_v51  ;;  %v1170_v57 = vcombine.high %v1113_v50, %v1129_v51  ;;  %v1201_v58 = vcombine.low %v1145_v52, %v1161_v53  ;;  %v1202_v59 = vcombine.high %v1145_v52, %v1161_v53  ;;  %671 = vrot.lane.b32.xlu1 %v4530_v44, %s4332_s17 }
 0x172   : > { %v545_v62 = vcombine.low %v356_v34, %v368_v54  ;;  %v546_v63 = vcombine.high %v356_v34, %v368_v54 }
 0x173   : > { %v1177_v0 = vrot.slane %v1169_v56, %v4517_v29  ;;  %v1184_v1 = vrot.slane %v1170_v57, %v4517_v29  ;;  %v1209_v2 = vrot.slane %v1201_v58, %v4517_v29  ;;  %v1216_v3 = vrot.slane %v1202_v59, %v4517_v29 }
 0x174   : > { %v342_v4 = vpop.permute.xlu1 %341  ;;  %v4551_v5 = vpop.permute.xlu0 %365  ;;  %v553_v16 = vrot.slane %v545_v62, %v4510_v22  ;;  %v560_v17 = vrot.slane %v546_v63, %v4510_v22 }
 0x175   : > { %v1233_v6 = vcombine.low %v1177_v0, %v1209_v2  ;;  %v1234_v7 = vcombine.high %v1177_v0, %v1209_v2  ;;  %v1235_v8 = vcombine.low %v1184_v1, %v1216_v3  ;;  %v1236_v9 = vcombine.high %v1184_v1, %v1216_v3  ;;  %675 = vrot.lane.b32.xlu1 %v368_v54, %s4332_s17 }
 0x176   : > { %v377_v10 = vcombine.low %v4497_v11, %v342_v4  ;;  %v378_v12 = vcombine.high %v4497_v11, %v342_v4  ;;  %v409_v13 = vcombine.low %v4532_v45, %v4551_v5  ;;  %v410_v14 = vcombine.high %v4532_v45, %v4551_v5  ;;  %657 = vrot.lane.b32.xlu0 %v342_v4, %s4332_s17 }
 0x177   : > { %1243 = vst.msk [vmem:[#allocation2 + $0x8] sm:$0xff] %vm1241_vm1, %v1233_v6  ;;  %1245 = vst.msk [vmem:[#allocation2 + $0x18] sm:$0xff] %vm1241_vm1, %v1234_v7  ;;  %v408_v11 = vrot.slane %v394_v61, %v4510_v22 }
 0x178   : > { %1247 = vst.msk [vmem:[#allocation2 + $0x28] sm:$0xff] %vm1241_vm1, %v1235_v8  ;;  %1249 = vst.msk [vmem:[#allocation2 + $0x38] sm:$0xff] %vm1241_vm1, %v1236_v9  ;;  %v385_v18 = vrot.slane %v377_v10, %v4510_v22  ;;  %v392_v19 = vrot.slane %v378_v12, %v4510_v22  ;;  %v4572_v20 = vrot.slane %v409_v13, %v4510_v22  ;;  %v374_v23 = vpop.permute.xlu1 %373  ;;  %v4577_v24 = vpop.permute.xlu0 %371 }
 0x179   : > { %v4575_v21 = vrot.slane %v410_v14, %v4510_v22  ;;  %v561_v25 = vcombine.low %v4530_v44, %v374_v23  ;;  %v562_v26 = vcombine.high %v4530_v44, %v374_v23  ;;  %v425_v27 = vcombine.low %v4539_v55, %v4577_v24  ;;  %679 = vrot.lane.b32.xlu1 %v374_v23, %s4332_s17 }
 0x17a   : > { %v426_v28 = vcombine.high %v4539_v55, %v4577_v24  ;;  %v441_v30 = vcombine.low %v385_v18, %v401_v15  ;;  %v442_v31 = vcombine.high %v385_v18, %v401_v15  ;;  %v457_v32 = vcombine.low %v392_v19, %v408_v11  ;;  %661 = vrot.lane.b32.xlu0 %v4523_v35, %s4332_s17 }
 0x17b   : > { %v458_v33 = vcombine.high %v392_v19, %v408_v11  ;;  %v569_v34 = vrot.slane %v561_v25, %v4510_v22  ;;  %v576_v36 = vrot.slane %v562_v26, %v4510_v22  ;;  %v4591_v37 = vrot.slane %v425_v27, %v4510_v22 }
 0x17c   : > { %v4594_v38 = vrot.slane %v426_v28, %v4510_v22  ;;  %v449_v39 = vrot.slane %v441_v30, %v4517_v29  ;;  %v456_v40 = vrot.slane %v442_v31, %v4517_v29  ;;  %v465_v41 = vrot.slane %v457_v32, %v4517_v29 }
 0x17d   : > { %v472_v42 = vrot.slane %v458_v33, %v4517_v29  ;;  %v609_v43 = vcombine.low %v553_v16, %v569_v34  ;;  %v610_v35 = vcombine.high %v553_v16, %v569_v34  ;;  %v625_v44 = vcombine.low %v560_v17, %v576_v36 }
 0x17e   : > { %v626_v46 = vcombine.high %v560_v17, %v576_v36  ;;  %v3765_v47 = vcombine.low %v449_v39, %v456_v40  ;;  %v3767_v48 = vcombine.high %v449_v39, %v456_v40  ;;  %665 = vrot.lane.b32.xlu0 %v4532_v45, %s4332_s17  ;;  %v473_v27 = vcombine.low %v4572_v20, %v4591_v37 }
 0x17f   : > { %v3769_v49 = vcombine.low %v465_v41, %v472_v42  ;;  %v3771_v50 = vcombine.high %v465_v41, %v472_v42  ;;  %v617_v51 = vrot.slane %v609_v43, %v4517_v29  ;;  %v624_v52 = vrot.slane %v610_v35, %v4517_v29 }
 0x180   : > { %v633_v53 = vrot.slane %v625_v44, %v4517_v29  ;;  %v640_v54 = vrot.slane %v626_v46, %v4517_v29  ;;  %v977_v56 = vrot.slane %v3765_v47, %v4510_v22  ;;  %v993_v57 = vrot.slane %v3767_v48, %v4510_v22 }
 0x181   : > { %v1009_v58 = vrot.slane %v3769_v49, %v4510_v22  ;;  %v1025_v59 = vrot.slane %v3771_v50, %v4510_v22  ;;  %v3774_v60 = vcombine.low %v617_v51, %v624_v52  ;;  %v3776_v61 = vcombine.high %v617_v51, %v624_v52 }
 0x182   : > { %v3778_v62 = vcombine.low %v633_v53, %v640_v54  ;;  %v3780_v45 = vcombine.high %v633_v53, %v640_v54  ;;  %v1033_v63 = vcombine.low %v977_v56, %v993_v57  ;;  %v1034_v0 = vcombine.high %v977_v56, %v993_v57  ;;  %669 = vrot.lane.b32.xlu0 %v4539_v55, %s4332_s17 }
 0x183   : > { %v1065_v1 = vcombine.low %v1009_v58, %v1025_v59  ;;  %v1066_v2 = vcombine.high %v1009_v58, %v1025_v59  ;;  %v1120_v3 = vrot.slane %v3774_v60, %v4510_v22  ;;  %v1136_v4 = vrot.slane %v3776_v61, %v4510_v22  ;;  %v652_v58 = vpop.permute.xlu1 %651 }
 0x184   : > { %v1152_v6 = vrot.slane %v3778_v62, %v4510_v22  ;;  %v1168_v7 = vrot.slane %v3780_v45, %v4510_v22  ;;  %v1041_v8 = vrot.slane %v1033_v63, %v4517_v29  ;;  %v1048_v9 = vrot.slane %v1034_v0, %v4517_v29 }
 0x185   : > { %v1073_v10 = vrot.slane %v1065_v1, %v4517_v29  ;;  %v1080_v12 = vrot.slane %v1066_v2, %v4517_v29  ;;  %v1185_v13 = vcombine.low %v1120_v3, %v1136_v4  ;;  %v1186_v14 = vcombine.high %v1120_v3, %v1136_v4 }
 0x186   : > { %v1217_v15 = vcombine.low %v1152_v6, %v1168_v7  ;;  %v1218_v55 = vcombine.high %v1152_v6, %v1168_v7  ;;  %673 = vrot.lane.b32.xlu0 %v4551_v5, %s4332_s17  ;;  %v474_v5 = vcombine.high %v4572_v20, %v4591_v37  ;;  %v489_v28 = vcombine.low %v4575_v21, %v4594_v38  ;;  %v650_v7 = vpop.permute.xlu0 %649 }
 0x187   : > { %v1097_v11 = vcombine.low %v1041_v8, %v1073_v10  ;;  %v1098_v16 = vcombine.high %v1041_v8, %v1073_v10  ;;  %v1099_v17 = vcombine.low %v1048_v9, %v1080_v12  ;;  %v1100_v18 = vcombine.high %v1048_v9, %v1080_v12 }
 0x188   : > { %v1193_v19 = vrot.slane %v1185_v13, %v4517_v29  ;;  %v1200_v23 = vrot.slane %v1186_v14, %v4517_v29  ;;  %v1225_v25 = vrot.slane %v1217_v15, %v4517_v29  ;;  %v1232_v26 = vrot.slane %v1218_v55, %v4517_v29 }
 0x189   : > { %1242 = vst.msk [vmem:[#allocation2] sm:$0xff] %vm1241_vm1, %v1097_v11  ;;  %1244 = vst.msk [vmem:[#allocation2 + $0x10] sm:$0xff] %vm1241_vm1, %v1098_v16  ;;  %v490_v30 = vcombine.high %v4575_v21, %v4594_v38  ;;  %v481_v36 = vrot.slane %v473_v27, %v4517_v29  ;;  %v488_v39 = vrot.slane %v474_v5, %v4517_v29 }
 0x18a   : > { %1246 = vst.msk [vmem:[#allocation2 + $0x20] sm:$0xff] %vm1241_vm1, %v1099_v17  ;;  %1248 = vst.msk [vmem:[#allocation2 + $0x30] sm:$0xff] %vm1241_vm1, %v1100_v18  ;;  %v1237_v31 = vcombine.low %v1193_v19, %v1225_v25  ;;  %v1238_v32 = vcombine.high %v1193_v19, %v1225_v25  ;;  %v1239_v33 = vcombine.low %v1200_v23, %v1232_v26  ;;  %677 = vrot.lane.b32.xlu0 %v4577_v24, %s4332_s17 }
 0x18b   : > { %v1240_v34 = vcombine.high %v1200_v23, %v1232_v26  ;;  %v497_v40 = vrot.slane %v489_v28, %v4517_v29  ;;  %v504_v41 = vrot.slane %v490_v30, %v4517_v29  ;;  %v3766_v20 = vcombine.low %v481_v36, %v488_v39 }
 0x18c   : > { %1251 = vst.msk [vmem:[#allocation2 + $0x48] sm:$0xff] %vm1241_vm1, %v1237_v31  ;;  %1253 = vst.msk [vmem:[#allocation2 + $0x58] sm:$0xff] %vm1241_vm1, %v1238_v32  ;;  %v3768_v21 = vcombine.high %v481_v36, %v488_v39 }
 0x18d   : > { %1255 = vst.msk [vmem:[#allocation2 + $0x68] sm:$0xff] %vm1241_vm1, %v1239_v33  ;;  %1257 = vst.msk [vmem:[#allocation2 + $0x78] sm:$0xff] %vm1241_vm1, %v1240_v34  ;;  %v3770_v37 = vcombine.low %v497_v40, %v504_v41  ;;  %v3772_v38 = vcombine.high %v497_v40, %v504_v41  ;;  %v984_v42 = vrot.slane %v3766_v20, %v4510_v22 }
 0x18e   : > { %v1000_v43 = vrot.slane %v3768_v21, %v4510_v22 }
 0x18f   : > { %v1016_v35 = vrot.slane %v3770_v37, %v4510_v22  ;;  %v1032_v24 = vrot.slane %v3772_v38, %v4510_v22 }
 0x190   : > { %v1049_v44 = vcombine.low %v984_v42, %v1000_v43  ;;  %v1050_v46 = vcombine.high %v984_v42, %v1000_v43 }
 0x191   : > { %v1081_v47 = vcombine.low %v1016_v35, %v1032_v24  ;;  %v1082_v48 = vcombine.high %v1016_v35, %v1032_v24 }
 0x192   : > { %v1057_v49 = vrot.slane %v1049_v44, %v4517_v29  ;;  %v1064_v50 = vrot.slane %v1050_v46, %v4517_v29 }
 0x193   : > { %v1089_v51 = vrot.slane %v1081_v47, %v4517_v29  ;;  %v1096_v52 = vrot.slane %v1082_v48, %v4517_v29 }
 0x195   : > { %v1101_v53 = vcombine.low %v1057_v49, %v1089_v51  ;;  %v1102_v54 = vcombine.high %v1057_v49, %v1089_v51  ;;  %v1103_v56 = vcombine.low %v1064_v50, %v1096_v52  ;;  %v1104_v57 = vcombine.high %v1064_v50, %v1096_v52 }
 0x197   : > { %1250 = vst.msk [vmem:[#allocation2 + $0x40] sm:$0xff] %vm1241_vm1, %v1101_v53  ;;  %1252 = vst.msk [vmem:[#allocation2 + $0x50] sm:$0xff] %vm1241_vm1, %v1102_v54 }
 0x198   : > { %1254 = vst.msk [vmem:[#allocation2 + $0x60] sm:$0xff] %vm1241_vm1, %v1103_v56  ;;  %1256 = vst.msk [vmem:[#allocation2 + $0x70] sm:$0xff] %vm1241_vm1, %v1104_v57 }
 0x1d3   : > { %v656_v59 = vpop.permute.xlu1 %655 }
 0x1d7   : > { %v660_v60 = vpop.permute.xlu1 %659  ;;  %v654_v16 = vpop.permute.xlu0 %653 }
 0x1d8   : > { %v833_v61 = vcombine.low %v652_v58, %v660_v60  ;;  %v834_v62 = vcombine.high %v652_v58, %v660_v60 }
 0x1da   : > { %v841_v1 = vrot.slane %v833_v61, %v4510_v22  ;;  %v848_v2 = vrot.slane %v834_v62, %v4510_v22 }
 0x1db   : > { %v664_v45 = vpop.permute.xlu1 %663 }
 0x1dc   : > { %v849_v63 = vcombine.low %v656_v59, %v664_v45  ;;  %v850_v0 = vcombine.high %v656_v59, %v664_v45 }
 0x1de   : > { %v857_v3 = vrot.slane %v849_v63, %v4510_v22  ;;  %v864_v4 = vrot.slane %v850_v0, %v4510_v22 }
 0x1df   : > { %v668_v6 = vpop.permute.xlu1 %667 }
 0x1e0   : > { %v897_v8 = vcombine.low %v841_v1, %v857_v3  ;;  %v898_v9 = vcombine.high %v841_v1, %v857_v3  ;;  %v913_v10 = vcombine.low %v848_v2, %v864_v4  ;;  %v914_v12 = vcombine.high %v848_v2, %v864_v4 }
 0x1e2   : > { %v905_v13 = vrot.slane %v897_v8, %v4517_v29  ;;  %v912_v14 = vrot.slane %v898_v9, %v4517_v29  ;;  %v921_v15 = vrot.slane %v913_v10, %v4517_v29  ;;  %v928_v55 = vrot.slane %v914_v12, %v4517_v29 }
 0x1e3   : > { %v672_v11 = vpop.permute.xlu1 %671 }
 0x1e4   : > { %v3789_v17 = vcombine.low %v905_v13, %v912_v14  ;;  %v3791_v18 = vcombine.high %v905_v13, %v912_v14  ;;  %v3793_v19 = vcombine.low %v921_v15, %v928_v55  ;;  %v3795_v23 = vcombine.high %v921_v15, %v928_v55 }
 0x1e6   : > { %v1402_v25 = vrot.slane %v3789_v17, %v4510_v22  ;;  %v1418_v26 = vrot.slane %v3791_v18, %v4510_v22  ;;  %v1434_v27 = vrot.slane %v3793_v19, %v4510_v22  ;;  %v1450_v5 = vrot.slane %v3795_v23, %v4510_v22 }
 0x1e7   : > { %v676_v28 = vpop.permute.xlu1 %675 }
 0x1e8   : > { %v1458_v30 = vcombine.low %v1402_v25, %v1418_v26  ;;  %v1459_v31 = vcombine.high %v1402_v25, %v1418_v26  ;;  %v1490_v32 = vcombine.low %v1434_v27, %v1450_v5  ;;  %v1491_v33 = vcombine.high %v1434_v27, %v1450_v5  ;;  %v658_v34 = vpop.permute.xlu0 %657 }
 0x1e9   : > { %v865_v36 = vcombine.low %v668_v6, %v676_v28  ;;  %v866_v39 = vcombine.high %v668_v6, %v676_v28  ;;  %v697_v37 = vcombine.low %v650_v7, %v658_v34  ;;  %v698_v38 = vcombine.high %v650_v7, %v658_v34 }
 0x1ea   : > { %v1466_v40 = vrot.slane %v1458_v30, %v4517_v29  ;;  %v1473_v41 = vrot.slane %v1459_v31, %v4517_v29  ;;  %v1498_v20 = vrot.slane %v1490_v32, %v4517_v29  ;;  %v1505_v21 = vrot.slane %v1491_v33, %v4517_v29 }
 0x1eb   : > { %v680_v42 = vpop.permute.xlu1 %679  ;;  %v873_v51 = vrot.slane %v865_v36, %v4510_v22  ;;  %v880_v52 = vrot.slane %v866_v39, %v4510_v22  ;;  %v705_v58 = vrot.slane %v697_v37, %v4510_v22  ;;  %v712_v59 = vrot.slane %v698_v38, %v4510_v22 }
 0x1ec   : > { %v1522_v43 = vcombine.low %v1466_v40, %v1498_v20  ;;  %v1523_v35 = vcombine.high %v1466_v40, %v1498_v20  ;;  %v1524_v24 = vcombine.low %v1473_v41, %v1505_v21  ;;  %v1525_v44 = vcombine.high %v1473_v41, %v1505_v21  ;;  %v662_v46 = vpop.permute.xlu0 %661 }
 0x1ed   : > { %v881_v47 = vcombine.low %v672_v11, %v680_v42  ;;  %v882_v48 = vcombine.high %v672_v11, %v680_v42  ;;  %v713_v49 = vcombine.low %v654_v16, %v662_v46  ;;  %v714_v50 = vcombine.high %v654_v16, %v662_v46 }
 0x1ee   : > { %1531 = vst.msk [vmem:[#allocation3 + $0x8] sm:$0xff] %vm1241_vm1, %v1522_v43  ;;  %1533 = vst.msk [vmem:[#allocation3 + $0x18] sm:$0xff] %vm1241_vm1, %v1523_v35 }
 0x1ef   : > { %1535 = vst.msk [vmem:[#allocation3 + $0x28] sm:$0xff] %vm1241_vm1, %v1524_v24  ;;  %1537 = vst.msk [vmem:[#allocation3 + $0x38] sm:$0xff] %vm1241_vm1, %v1525_v44  ;;  %v889_v53 = vrot.slane %v881_v47, %v4510_v22  ;;  %v896_v54 = vrot.slane %v882_v48, %v4510_v22  ;;  %v721_v56 = vrot.slane %v713_v49, %v4510_v22 }
 0x1f0   : > { %v728_v57 = vrot.slane %v714_v50, %v4510_v22  ;;  %v4688_v60 = vpop.permute.xlu0 %665 }
 0x1f1   : > { %v929_v61 = vcombine.low %v873_v51, %v889_v53  ;;  %v930_v62 = vcombine.high %v873_v51, %v889_v53  ;;  %v945_v45 = vcombine.low %v880_v52, %v896_v54  ;;  %v946_v63 = vcombine.high %v880_v52, %v896_v54 }
 0x1f2   : > { %v761_v0 = vcombine.low %v705_v58, %v721_v56  ;;  %v762_v1 = vcombine.high %v705_v58, %v721_v56  ;;  %v777_v2 = vcombine.low %v712_v59, %v728_v57  ;;  %v778_v3 = vcombine.high %v712_v59, %v728_v57 }
 0x1f3   : > { %v937_v4 = vrot.slane %v929_v61, %v4517_v29  ;;  %v944_v6 = vrot.slane %v930_v62, %v4517_v29  ;;  %v953_v7 = vrot.slane %v945_v45, %v4517_v29  ;;  %v960_v8 = vrot.slane %v946_v63, %v4517_v29 }
 0x1f4   : > { %v769_v9 = vrot.slane %v761_v0, %v4517_v29  ;;  %v776_v10 = vrot.slane %v762_v1, %v4517_v29  ;;  %v785_v12 = vrot.slane %v777_v2, %v4517_v29  ;;  %v792_v13 = vrot.slane %v778_v3, %v4517_v29  ;;  %v670_v14 = vpop.permute.xlu0 %669 }
 0x1f5   : > { %v3790_v15 = vcombine.low %v937_v4, %v944_v6  ;;  %v3792_v55 = vcombine.high %v937_v4, %v944_v6  ;;  %v3794_v11 = vcombine.low %v953_v7, %v960_v8  ;;  %v3796_v16 = vcombine.high %v953_v7, %v960_v8 }
 0x1f6   : > { %v3781_v17 = vcombine.low %v769_v9, %v776_v10  ;;  %v3783_v18 = vcombine.high %v769_v9, %v776_v10  ;;  %v3785_v19 = vcombine.low %v785_v12, %v792_v13  ;;  %v3787_v23 = vcombine.high %v785_v12, %v792_v13 }
 0x1f7   : > { %v1409_v25 = vrot.slane %v3790_v15, %v4510_v22  ;;  %v1425_v26 = vrot.slane %v3792_v55, %v4510_v22  ;;  %v1441_v27 = vrot.slane %v3794_v11, %v4510_v22  ;;  %v1457_v5 = vrot.slane %v3796_v16, %v4510_v22 }
 0x1f8   : > { %v1266_v28 = vrot.slane %v3781_v17, %v4510_v22  ;;  %v1282_v30 = vrot.slane %v3783_v18, %v4510_v22  ;;  %v1298_v31 = vrot.slane %v3785_v19, %v4510_v22  ;;  %v1314_v32 = vrot.slane %v3787_v23, %v4510_v22  ;;  %v674_v33 = vpop.permute.xlu0 %673 }
 0x1f9   : > { %v1474_v34 = vcombine.low %v1409_v25, %v1425_v26  ;;  %v1475_v36 = vcombine.high %v1409_v25, %v1425_v26  ;;  %v1506_v39 = vcombine.low %v1441_v27, %v1457_v5  ;;  %v1507_v40 = vcombine.high %v1441_v27, %v1457_v5 }
 0x1fa   : > { %v1322_v41 = vcombine.low %v1266_v28, %v1282_v30  ;;  %v1323_v20 = vcombine.high %v1266_v28, %v1282_v30  ;;  %v1354_v21 = vcombine.low %v1298_v31, %v1314_v32  ;;  %v1355_v37 = vcombine.high %v1298_v31, %v1314_v32 }
 0x1fb   : > { %v1482_v38 = vrot.slane %v1474_v34, %v4517_v29  ;;  %v1489_v42 = vrot.slane %v1475_v36, %v4517_v29  ;;  %v1514_v43 = vrot.slane %v1506_v39, %v4517_v29  ;;  %v1521_v35 = vrot.slane %v1507_v40, %v4517_v29 }
 0x1fc   : > { %v1330_v24 = vrot.slane %v1322_v41, %v4517_v29  ;;  %v1337_v44 = vrot.slane %v1323_v20, %v4517_v29  ;;  %v1362_v46 = vrot.slane %v1354_v21, %v4517_v29  ;;  %v1369_v47 = vrot.slane %v1355_v37, %v4517_v29  ;;  %v678_v48 = vpop.permute.xlu0 %677 }
 0x1fd   : > { %v1526_v49 = vcombine.low %v1482_v38, %v1514_v43  ;;  %v1527_v50 = vcombine.high %v1482_v38, %v1514_v43  ;;  %v1528_v51 = vcombine.low %v1489_v42, %v1521_v35  ;;  %v1529_v52 = vcombine.high %v1489_v42, %v1521_v35 }
 0x1fe   : > { %v1386_v53 = vcombine.low %v1330_v24, %v1362_v46  ;;  %v1387_v54 = vcombine.high %v1330_v24, %v1362_v46  ;;  %v1388_v56 = vcombine.low %v1337_v44, %v1369_v47  ;;  %v1389_v57 = vcombine.high %v1337_v44, %v1369_v47 }
 0x1ff   : > { %1539 = vst.msk [vmem:[#allocation3 + $0x48] sm:$0xff] %vm1241_vm1, %v1526_v49  ;;  %1541 = vst.msk [vmem:[#allocation3 + $0x58] sm:$0xff] %vm1241_vm1, %v1527_v50  ;;  %v729_v58 = vcombine.low %v4688_v60, %v674_v33  ;;  %v730_v59 = vcombine.high %v4688_v60, %v674_v33  ;;  %v745_v61 = vcombine.low %v670_v14, %v678_v48 }
 0x200   : > { %1543 = vst.msk [vmem:[#allocation3 + $0x68] sm:$0xff] %vm1241_vm1, %v1528_v51  ;;  %1545 = vst.msk [vmem:[#allocation3 + $0x78] sm:$0xff] %vm1241_vm1, %v1529_v52  ;;  %v746_v62 = vcombine.high %v670_v14, %v678_v48 }
 0x201   : > { %1530 = vst.msk [vmem:[#allocation3] sm:$0xff] %vm1241_vm1, %v1386_v53  ;;  %1532 = vst.msk [vmem:[#allocation3 + $0x10] sm:$0xff] %vm1241_vm1, %v1387_v54  ;;  %v737_v45 = vrot.slane %v729_v58, %v4510_v22  ;;  %v744_v63 = vrot.slane %v730_v59, %v4510_v22  ;;  %v753_v0 = vrot.slane %v745_v61, %v4510_v22 }
 0x202   : > { %1534 = vst.msk [vmem:[#allocation3 + $0x20] sm:$0xff] %vm1241_vm1, %v1388_v56  ;;  %1536 = vst.msk [vmem:[#allocation3 + $0x30] sm:$0xff] %vm1241_vm1, %v1389_v57  ;;  %v760_v1 = vrot.slane %v746_v62, %v4510_v22 }
 0x203   : > { %v793_v2 = vcombine.low %v737_v45, %v753_v0  ;;  %v794_v60 = vcombine.high %v737_v45, %v753_v0 }
 0x204   : > { %v809_v3 = vcombine.low %v744_v63, %v760_v1  ;;  %v810_v4 = vcombine.high %v744_v63, %v760_v1 }
 0x205   : > { %v801_v6 = vrot.slane %v793_v2, %v4517_v29  ;;  %v808_v7 = vrot.slane %v794_v60, %v4517_v29 }
 0x206   : > { %v817_v8 = vrot.slane %v809_v3, %v4517_v29  ;;  %v824_v9 = vrot.slane %v810_v4, %v4517_v29 }
 0x207   : > { %v3782_v10 = vcombine.low %v801_v6, %v808_v7  ;;  %v3784_v12 = vcombine.high %v801_v6, %v808_v7 }
 0x208   : > { %v3786_v13 = vcombine.low %v817_v8, %v824_v9  ;;  %v3788_v14 = vcombine.high %v817_v8, %v824_v9 }
 0x209   : > { %v1273_v15 = vrot.slane %v3782_v10, %v4510_v22  ;;  %v1289_v55 = vrot.slane %v3784_v12, %v4510_v22 }
 0x20a   : > { %v1305_v11 = vrot.slane %v3786_v13, %v4510_v22  ;;  %v1321_v16 = vrot.slane %v3788_v14, %v4510_v22 }
 0x20b   : > { %v1338_v17 = vcombine.low %v1273_v15, %v1289_v55  ;;  %v1339_v18 = vcombine.high %v1273_v15, %v1289_v55 }
 0x20c   : > { %v1370_v19 = vcombine.low %v1305_v11, %v1321_v16  ;;  %v1371_v23 = vcombine.high %v1305_v11, %v1321_v16 }
 0x20d   : > { %v1346_v25 = vrot.slane %v1338_v17, %v4517_v29  ;;  %v1353_v26 = vrot.slane %v1339_v18, %v4517_v29 }
 0x20e   : > { %v1378_v27 = vrot.slane %v1370_v19, %v4517_v29  ;;  %v1385_v5 = vrot.slane %v1371_v23, %v4517_v29 }
 0x210   : > { %v1390_v28 = vcombine.low %v1346_v25, %v1378_v27  ;;  %v1391_v30 = vcombine.high %v1346_v25, %v1378_v27  ;;  %v1392_v31 = vcombine.low %v1353_v26, %v1385_v5  ;;  %v1393_v32 = vcombine.high %v1353_v26, %v1385_v5 }
 0x212   : > { %1538 = vst.msk [vmem:[#allocation3 + $0x40] sm:$0xff] %vm1241_vm1, %v1390_v28  ;;  %1540 = vst.msk [vmem:[#allocation3 + $0x50] sm:$0xff] %vm1241_vm1, %v1391_v30 }
 0x213   : > { %1542 = vst.msk [vmem:[#allocation3 + $0x60] sm:$0xff] %vm1241_vm1, %v1392_v31  ;;  %1544 = vst.msk [vmem:[#allocation3 + $0x70] sm:$0xff] %vm1241_vm1, %v1393_v32 }
 0x214 PF: > { %v1556_v22 = vld [vmem:[%s5104_s1 + $0x38] sm:$0xff]  ;;  %v4335_v33 = vmov 0.0   ;;  %v1555_v29 = vld [vmem:[%s5104_s1 + $0x30] sm:$0xff]  ;;  %vm4336_vm2 = vmmov 0   ;;  %v1554_v34 = vld [vmem:[%s5104_s1 + $0x28] sm:$0xff]  ;;  %s3797_s9 = sshll.u32 %s4307_s21, 3  ;;  %v1658_v47 = vlaneseq }
 0x215   : > { %3950 = vmatprep.subr.mxu0 %v4335_v33  ;;  %3966 = vmatprep.mubr.msk.f32.mxu0 %vm4336_vm2, %v4335_v33  ;;  %v1553_v36 = vld [vmem:[%s5104_s1 + $0x20] sm:$0xff]  ;;  %v1552_v39 = vld [vmem:[%s5104_s1 + $0x18] sm:$0xff]  ;;  %v1551_v40 = vld [vmem:[%s5104_s1 + $0x10] sm:$0xff]  ;;  %s1547_s17 = scalar_lea.vmem %s4465_s26, %s3797_s9  ;;  %vm1557_vm3 = vcmask 523264   ;;  %s4337_s26 = smov 104   ;;  %vm1941_vm4 = vcmask 64512  }
 0x216   : > { %3951 = vmatpush3.msra.mxu0 %v1556_v22  ;;  %3969 = vmatprep.subr.mxu1 %v4335_v33  ;;  %v1550_v41 = vld [vmem:[%s5104_s1 + $0x8] sm:$0xff]  ;;  %v1549_v20 = vld [vmem:[%s5104_s1] sm:$0xff]  ;;  %s4338_s9 = smov 120   ;;  %s4339_s10 = smov 96   ;;  %v4344_v44 = vmov 1983009808  }
 0x217   : > { %3952 = vmatprep.subr.mxu0 %v4335_v33  ;;  %3973 = vmatprep.mubr.msk.f32.mxu1 %vm4336_vm2, %v4335_v33  ;;  %v1548_v21 = vld [vmem:[%s1547_s17] sm:$0xff]  ;;  %v1926_v42 = vld [vmem:[#allocation2 + $0x8] sm:$0xff]  ;;  %s4340_s14 = smov 112   ;;  %s4341_s16 = smov 80   ;;  %v1656_v46 = vunpack.c.l.s4 %v4344_v44  ;;  %v4345_v48 = vmov 1934713408  }
 0x218   : > { %3953 = vmatpush3.msra.mxu0 %v1555_v29  ;;  %3970 = vmatpush3.xpose.msk.msra.mxu1 %vm1941_vm4, %v1926_v42  ;;  %v1925_v43 = vld [vmem:[#allocation2] sm:$0xff]  ;;  %s4342_s15 = smov 88   ;;  %v1934_v35 = vld [vmem:[#allocation2 + $0x48] sm:$0xff]  ;;  %s4343_s17 = smov 72   ;;  %v1720_v49 = vunpack.c.l.s4 %v4345_v48  ;;  %v1659_v51 = vshrl.u32 %v1658_v47, 7  ;;  %vm2574_vm5 = vcmask 130048  }
 0x219   : > { %3954 = vmatprep.subr.mxu0 %v4335_v33  ;;  %3971 = vmatprep.subr.mxu1 %v4335_v33  ;;  %v1933_v24 = vld [vmem:[#allocation2 + $0x40] sm:$0xff]  ;;  %v1657_v50 = vunpack.c.0.s8 %v1656_v46  ;;  %s4346_s8 = smov 16   ;;  %vm3565_vm6 = vcmask 195584   ;;  %vm3567_vm7 = vcmask 261120   ;;  %vm3569_vm8 = vcmask 326656  }
 0x21a   : > { %3955 = vmatpush3.msra.mxu0 %v1554_v34  ;;  %v1721_v54 = vunpack.c.0.s8 %v1720_v49  ;;  %vm3571_vm9 = vcmask 392192   ;;  %vm3573_vm10 = vcmask 457728  }
 0x21b   : > { %3956 = vmatprep.subr.mxu0 %v4335_v33  ;;  %v4795_v56 = vsub.s32 %v1657_v50, %v1659_v51 }
 0x21c   : > { %3957 = vmatpush3.msra.mxu0 %v1553_v36  ;;  %3972 = vmatpush3.xpose.msk.msra.mxu1 %vm1941_vm4, %v1925_v43  ;;  %v4797_v63 = vsub.s32 %v1721_v54, %v1659_v51 }
 0x21d   : > { %3958 = vmatprep.subr.mxu0 %v4335_v33  ;;  %3976 = vmatprep.subr.mxu1 %v4335_v33 }
 0x21e   : > { %3959 = vmatpush3.msra.mxu0 %v1552_v39 }
 0x21f   : > { %3960 = vmatprep.subr.mxu0 %v4335_v33 }
 0x220   : > { %3961 = vmatpush3.msra.mxu0 %v1551_v40 }
 0x221   : > { %3962 = vmatprep.subr.mxu0 %v4335_v33 }
 0x222   : > { %3963 = vmatpush3.msra.mxu0 %v1550_v41 }
 0x223   : > { %3964 = vmatprep.subr.mxu0 %v4335_v33 }
 0x224   : > { %3965 = vmatpush3.msra.mxu0 %v1549_v20 }
 0x225   : > { %3967 = vmatmul.mubr.msk.f32.vlgmr.msra.gmra.mxu0 %vm1557_vm3, %v1548_v21  ;;  %3997 = vmatprep.subr.mxu0 %v4335_v33 }
 0x226   : > { %4001 = vmatprep.mubr.msk.f32.mxu0 %vm4336_vm2, %v4335_v33  ;;  %3998 = vmatpush3.xpose.msk.msra.mxu0 %vm1941_vm4, %v1934_v35 }
 0x227   : > { %3999 = vmatprep.subr.mxu0 %v4335_v33 }
 0x22a   : > { %4000 = vmatpush3.xpose.msk.msra.mxu0 %vm1941_vm4, %v1933_v24  ;;  %v1928_v24 = vld [vmem:[#allocation2 + $0x18] sm:$0xff] }
 0x22b   : > { %4011 = vmatprep.subr.mxu0 %v4335_v33 }
 0x2e5   : > { %v1627_v37 = vpop.f32.mrf.mxu0 }
 0x2e6   : > { %1638 = vrot.lane.b32.xlu1 %v1627_v37, %s4337_s26  ;;  %1632 = vrot.lane.b32.xlu0 %v1627_v37, %s4338_s9  ;;  %s4347_s26 = smov 8   ;;  %s4351_s9 = smov 56  }
 0x2e7   : > { %v3968_v38 = vpop.f32.mrf.mxu0 }
 0x2ea   : > { %1641 = vrot.lane.b32.xlu1 %v1627_v37, %s4339_s10  ;;  %1635 = vrot.lane.b32.xlu0 %v1627_v37, %s4340_s14  ;;  %s4348_s14 = smov 24   ;;  %s4352_s10 = smov 48  }
 0x2ee   : > { %1647 = vrot.lane.b32.xlu1 %v1627_v37, %s4341_s16  ;;  %1644 = vrot.lane.b32.xlu0 %v1627_v37, %s4342_s15 }
 0x2f2   : > { %1650 = vrot.lane.b32.xlu0 %v1627_v37, %s4343_s17 }
 0x358   : > { %v1639_v52 = vpop.permute.xlu1 %1638  ;;  %v1633_v53 = vpop.permute.xlu0 %1632 }
 0x359   : > { %v1669_v57 = vcombine.low %v1633_v53, %v1639_v52  ;;  %v1670_v58 = vcombine.high %v1633_v53, %v1639_v52  ;;  %v1927_v53 = vld [vmem:[#allocation2 + $0x10] sm:$0xff] }
 0x35b   : > { %v1677_v0 = vrot.slane %v1669_v57, %v4795_v56  ;;  %v1684_v1 = vrot.slane %v1670_v58, %v4795_v56 }
 0x35c   : > { %v1642_v59 = vpop.permute.xlu1 %1641  ;;  %v1636_v61 = vpop.permute.xlu0 %1635 }
 0x35d   : > { %v1653_v62 = vcombine.low %v1627_v37, %v1636_v61  ;;  %v1654_v45 = vcombine.high %v1627_v37, %v1636_v61 }
 0x35f   : > { %v1661_v2 = vrot.slane %v1653_v62, %v4795_v56  ;;  %v1668_v60 = vrot.slane %v1654_v45, %v4795_v56 }
 0x360   : > { %v1645_v3 = vpop.permute.xlu0 %1644  ;;  %v1648_v9 = vpop.permute.xlu1 %1647 }
 0x361   : > { %v1717_v4 = vcombine.low %v1661_v2, %v1677_v0  ;;  %v1718_v6 = vcombine.high %v1661_v2, %v1677_v0  ;;  %v1733_v7 = vcombine.low %v1668_v60, %v1684_v1  ;;  %v1734_v8 = vcombine.high %v1668_v60, %v1684_v1  ;;  %v1930_v0 = vld [vmem:[#allocation2 + $0x28] sm:$0xff] }
 0x362   : > { %v1685_v15 = vcombine.low %v1642_v59, %v1648_v9  ;;  %v1686_v55 = vcombine.high %v1642_v59, %v1648_v9 }
 0x363   : > { %v1725_v10 = vrot.slane %v1717_v4, %v4797_v63  ;;  %v1732_v12 = vrot.slane %v1718_v6, %v4797_v63  ;;  %v1741_v13 = vrot.slane %v1733_v7, %v4797_v63  ;;  %v1748_v14 = vrot.slane %v1734_v8, %v4797_v63  ;;  %v1929_v4 = vld [vmem:[#allocation2 + $0x20] sm:$0xff] }
 0x364   : > { %v1651_v11 = vpop.permute.xlu0 %1650  ;;  %v1693_v30 = vrot.slane %v1685_v15, %v4795_v56  ;;  %v1700_v31 = vrot.slane %v1686_v55, %v4795_v56  ;;  %v1937_v8 = vld [vmem:[#allocation2 + $0x60] sm:$0xff]  ;;  %v1931_v15 = vld [vmem:[#allocation2 + $0x30] sm:$0xff] }
 0x365   : > { %v3799_v16 = vcombine.low %v1725_v10, %v1732_v12  ;;  %v3801_v17 = vcombine.high %v1725_v10, %v1732_v12  ;;  %v3803_v18 = vcombine.low %v1741_v13, %v1748_v14  ;;  %v3805_v19 = vcombine.high %v1741_v13, %v1748_v14  ;;  %v1932_v13 = vld [vmem:[#allocation2 + $0x38] sm:$0xff] }
 0x366   : > { %v1701_v23 = vcombine.low %v1645_v3, %v1651_v11  ;;  %v1702_v25 = vcombine.high %v1645_v3, %v1651_v11  ;;  %v1938_v3 = vld [vmem:[#allocation2 + $0x68] sm:$0xff]  ;;  %v1936_v11 = vld [vmem:[#allocation2 + $0x58] sm:$0xff] }
 0x367   : > { %v1797_v26 = vrot.slane %v3799_v16, %v4795_v56  ;;  %v1813_v27 = vrot.slane %v3801_v17, %v4795_v56  ;;  %v1829_v5 = vrot.slane %v3803_v18, %v4795_v56  ;;  %v1845_v28 = vrot.slane %v3805_v19, %v4795_v56  ;;  %v1935_v16 = vld [vmem:[#allocation2 + $0x50] sm:$0xff]  ;;  %v1940_v18 = vld [vmem:[#allocation2 + $0x78] sm:$0xff] }
 0x368   : > { %v1709_v32 = vrot.slane %v1701_v23, %v4795_v56  ;;  %v1716_v22 = vrot.slane %v1702_v25, %v4795_v56  ;;  %v1939_v19 = vld [vmem:[#allocation2 + $0x70] sm:$0xff] }
 0x369   : > { %v1853_v29 = vcombine.low %v1797_v26, %v1813_v27  ;;  %v1885_v34 = vcombine.low %v1829_v5, %v1845_v28  ;;  %v1854_v61 = vcombine.high %v1797_v26, %v1813_v27  ;;  %v1886_v62 = vcombine.high %v1829_v5, %v1845_v28 }
 0x36a   : > { %v1749_v36 = vcombine.low %v1693_v30, %v1709_v32  ;;  %v1750_v39 = vcombine.high %v1693_v30, %v1709_v32  ;;  %v1765_v40 = vcombine.low %v1700_v31, %v1716_v22  ;;  %v1766_v41 = vcombine.high %v1700_v31, %v1716_v22 }
 0x36b   : > { %v1861_v20 = vrot.slane %v1853_v29, %v4797_v63  ;;  %v1893_v21 = vrot.slane %v1885_v34, %v4797_v63  ;;  %v1868_v6 = vrot.slane %v1854_v61, %v4797_v63  ;;  %v1900_v7 = vrot.slane %v1886_v62, %v4797_v63 }
 0x36c   : > { %v1757_v37 = vrot.slane %v1749_v36, %v4797_v63  ;;  %v1764_v38 = vrot.slane %v1750_v39, %v4797_v63  ;;  %v1773_v42 = vrot.slane %v1765_v40, %v4797_v63  ;;  %v1780_v43 = vrot.slane %v1766_v41, %v4797_v63 }
 0x36d   : > { %v1917_v35 = vcombine.low %v1861_v20, %v1893_v21  ;;  %v1918_v45 = vcombine.high %v1861_v20, %v1893_v21  ;;  %v1919_v12 = vcombine.low %v1868_v6, %v1900_v7  ;;  %v1920_v55 = vcombine.high %v1868_v6, %v1900_v7 }
 0x36e   : > { %v3800_v44 = vcombine.low %v1757_v37, %v1764_v38  ;;  %v3802_v46 = vcombine.high %v1757_v37, %v1764_v38  ;;  %v3804_v47 = vcombine.low %v1773_v42, %v1780_v43  ;;  %v3806_v48 = vcombine.high %v1773_v42, %v1780_v43 }
 0x36f   : > { %3974 = vmatmul.mubr.msk.f32.vlgmr.msra.gmra.mxu1 %vm1941_vm4, %v1917_v35 }
 0x370   : > { %v1804_v49 = vrot.slane %v3800_v44, %v4795_v56  ;;  %v1820_v50 = vrot.slane %v3802_v46, %v4795_v56  ;;  %v1836_v51 = vrot.slane %v3804_v47, %v4795_v56  ;;  %v1852_v52 = vrot.slane %v3806_v48, %v4795_v56  ;;  %3977 = vmatpush3.xpose.msk.msra.mxu1 %vm1941_vm4, %v1928_v24 }
 0x371   : > { %3978 = vmatprep.subr.mxu1 %v4335_v33  ;;  %3980 = vmatprep.mubr.msk.f32.mxu1 %vm4336_vm2, %v4335_v33 }
 0x372   : > { %v1869_v54 = vcombine.low %v1804_v49, %v1820_v50  ;;  %v1901_v57 = vcombine.low %v1836_v51, %v1852_v52  ;;  %v1870_v1 = vcombine.high %v1804_v49, %v1820_v50  ;;  %v1902_v2 = vcombine.high %v1836_v51, %v1852_v52 }
 0x374   : > { %3979 = vmatpush3.xpose.msk.msra.mxu1 %vm1941_vm4, %v1927_v53  ;;  %v1877_v58 = vrot.slane %v1869_v54, %v4797_v63  ;;  %v1909_v59 = vrot.slane %v1901_v57, %v4797_v63  ;;  %v1884_v9 = vrot.slane %v1870_v1, %v4797_v63  ;;  %v1916_v10 = vrot.slane %v1902_v2, %v4797_v63 }
 0x375   : > { %3983 = vmatprep.subr.mxu1 %v4335_v33 }
 0x376   : > { %v1921_v60 = vcombine.low %v1877_v58, %v1909_v59  ;;  %v1923_v14 = vcombine.low %v1884_v9, %v1916_v10  ;;  %v1922_v17 = vcombine.high %v1877_v58, %v1909_v59  ;;  %v1924_v23 = vcombine.high %v1884_v9, %v1916_v10 }
 0x377   : > { %3981 = vmatmul.mubr.msk.f32.vlgmr.msra.gmra.mxu1 %vm1941_vm4, %v1918_v45 }
 0x378   : > { %3984 = vmatpush3.xpose.msk.msra.mxu1 %vm1941_vm4, %v1930_v0  ;;  %4002 = vmatmul.mubr.msk.f32.vlgmr.msra.gmra.mxu0 %vm1941_vm4, %v1921_v60 }
 0x379   : > { %4012 = vmatpush3.xpose.msk.msra.mxu0 %vm1941_vm4, %v1938_v3  ;;  %3985 = vmatprep.subr.mxu1 %v4335_v33 }
 0x37a   : > { %4013 = vmatprep.subr.mxu0 %v4335_v33  ;;  %3987 = vmatprep.mubr.msk.f32.mxu1 %vm4336_vm2, %v4335_v33 }
 0x37b   : > { %4015 = vmatprep.mubr.msk.f32.mxu0 %vm4336_vm2, %v4335_v33 }
 0x37c   : > { %3986 = vmatpush3.xpose.msk.msra.mxu1 %vm1941_vm4, %v1929_v4 }
 0x37d   : > { %4014 = vmatpush3.xpose.msk.msra.mxu0 %vm1941_vm4, %v1937_v8  ;;  %3990 = vmatprep.subr.mxu1 %v4335_v33 }
 0x37e   : > { %4025 = vmatprep.subr.mxu0 %v4335_v33 }
 0x37f   : > { %3988 = vmatmul.mubr.msk.f32.vlgmr.msra.gmra.mxu1 %vm1941_vm4, %v1919_v12 }
 0x380   : > { %4016 = vmatmul.mubr.msk.f32.vlgmr.msra.gmra.mxu0 %vm1941_vm4, %v1923_v14  ;;  %3991 = vmatpush3.xpose.msk.msra.mxu1 %vm1941_vm4, %v1932_v13  ;;  %v2664_v14 = vld [vmem:[#allocation3 + $0x8] sm:$0xff] }
 0x381   : > { %3992 = vmatprep.subr.mxu1 %v4335_v33  ;;  %3994 = vmatprep.mubr.msk.f32.mxu1 %vm4336_vm2, %v4335_v33 }
 0x382   : > { %4029 = vmatprep.mubr.msk.f32.mxu0 %vm4336_vm2, %v4335_v33  ;;  %4026 = vmatpush3.msra.mxu0 %v2664_v14 }
 0x383   : > { %4027 = vmatprep.subr.mxu0 %v4335_v33 }
 0x384   : > { %3993 = vmatpush3.xpose.msk.msra.mxu1 %vm1941_vm4, %v1931_v15 }
 0x385   : > { %4004 = vmatprep.subr.mxu1 %v4335_v33 }
 0x387   : > { %3995 = vmatmul.mubr.msk.f32.vlgmr.msra.gmra.mxu1 %vm1941_vm4, %v1920_v55 }
 0x388   : > { %4005 = vmatpush3.xpose.msk.msra.mxu1 %vm1941_vm4, %v1936_v11  ;;  %4008 = vmatprep.mubr.msk.f32.mxu1 %vm4336_vm2, %v4335_v33 }
 0x389   : > { %4006 = vmatprep.subr.mxu1 %v4335_v33 }
 0x38c   : > { %4007 = vmatpush3.xpose.msk.msra.mxu1 %vm1941_vm4, %v1935_v16 }
 0x38d   : > { %4018 = vmatprep.subr.mxu1 %v4335_v33 }
 0x38f   : > { %4009 = vmatmul.mubr.msk.f32.vlgmr.msra.gmra.mxu1 %vm1941_vm4, %v1922_v17 }
 0x390   : > { %4019 = vmatpush3.xpose.msk.msra.mxu1 %vm1941_vm4, %v1940_v18  ;;  %4022 = vmatprep.mubr.msk.f32.mxu1 %vm4336_vm2, %v4335_v33 }
 0x391   : > { %4020 = vmatprep.subr.mxu1 %v4335_v33 }
 0x394   : > { %4021 = vmatpush3.xpose.msk.msra.mxu1 %vm1941_vm4, %v1939_v19 }
 0x395   : > { %4032 = vmatprep.subr.mxu1 %v4335_v33 }
 0x397   : > { %4023 = vmatmul.mubr.msk.f32.vlgmr.msra.gmra.mxu1 %vm1941_vm4, %v1924_v23 }
 0x398   : > { %4036 = vmatprep.mubr.msk.f32.mxu1 %vm4336_vm2, %v4335_v33 }
 0x42f   : > { %v2017_v25 = vpop.f32.mrf.mxu1 }
 0x430   : > { %v2575_v26 = vsel %vm2574_vm5, %v2017_v25, -inf }
 0x431   : > { %2576 = vmax.xlane.f32.xlu1 %v2575_v26  ;;  %v3975_v27 = vpop.f32.mrf.mxu1 }
 0x432   : > { %v2666_v27 = vld [vmem:[#allocation3 + $0x18] sm:$0xff] }
 0x433   : > { %4033 = vmatpush3.msra.mxu1 %v2666_v27 }
 0x434   : > { %4034 = vmatprep.subr.mxu1 %v4335_v33 }
 0x437   : > { %v2096_v5 = vpop.f32.mrf.mxu1 }
 0x438   : > { %v2333_v28 = vpop.f32.mrf.mxu0  ;;  %v2578_v30 = vsel %vm2574_vm5, %v2096_v5, -inf }
 0x439   : > { %2579 = vmax.xlane.f32.xlu0 %v2578_v30  ;;  %v3982_v31 = vpop.f32.mrf.mxu1  ;;  %v2587_v40 = vsel %vm2574_vm5, %v2333_v28, -inf }
 0x43a   : > { %v4003_v32 = vpop.f32.mrf.mxu0 }
 0x43f   : > { %v2175_v22 = vpop.f32.mrf.mxu1 }
 0x440   : > { %v2491_v29 = vpop.f32.mrf.mxu0  ;;  %v2581_v34 = vsel %vm2574_vm5, %v2175_v22, -inf }
 0x441   : > { %2582 = vmax.xlane.f32.xlu0 %v2581_v34  ;;  %v3989_v36 = vpop.f32.mrf.mxu1  ;;  %v2593_v21 = vsel %vm2574_vm5, %v2491_v29, -inf }
 0x442   : > { %v4017_v39 = vpop.f32.mrf.mxu0  ;;  %v2668_v36 = vld [vmem:[#allocation3 + $0x28] sm:$0xff] }
 0x445   : > { %2588 = vmax.xlane.f32.xlu0 %v2587_v40  ;;  %v2667_v40 = vld [vmem:[#allocation3 + $0x20] sm:$0xff] }
 0x447   : > { %v2254_v41 = vpop.f32.mrf.mxu1 }
 0x448   : > { %v2584_v20 = vsel %vm2574_vm5, %v2254_v41, -inf }
 0x449   : > { %2585 = vmax.xlane.f32.xlu1 %v2584_v20  ;;  %v3996_v37 = vpop.f32.mrf.mxu1  ;;  %2594 = vmax.xlane.f32.xlu0 %v2593_v21 }
 0x44a   : > { %v2670_v37 = vld [vmem:[#allocation3 + $0x38] sm:$0xff] }
 0x44f   : > { %v2412_v38 = vpop.f32.mrf.mxu1 }
 0x450   : > { %v2590_v42 = vsel %vm2574_vm5, %v2412_v38, -inf }
 0x451   : > { %2591 = vmax.xlane.f32.xlu1 %v2590_v42  ;;  %v4010_v43 = vpop.f32.mrf.mxu1 }
 0x452   : > { %v2669_v43 = vld [vmem:[#allocation3 + $0x30] sm:$0xff] }
 0x457   : > { %v2570_v35 = vpop.f32.mrf.mxu1 }
 0x458   : > { %v2596_v24 = vsel %vm2574_vm5, %v2570_v35, -inf }
 0x459   : > { %2597 = vmax.xlane.f32.xlu1 %v2596_v24  ;;  %v4024_v44 = vpop.f32.mrf.mxu1 }
 0x45a   : > { %v2672_v44 = vld [vmem:[#allocation3 + $0x48] sm:$0xff] }
 0x4ba   : > { %v2577_v46 = vpop.xlane.xlu1 %2576 }
 0x4bb   : > { %v2599_v47 = vsub.f32 %v2017_v25, %v2577_v46  ;;  %v2663_v25 = vld [vmem:[#allocation3] sm:$0xff] }
 0x4bc   : > { %4028 = vmatpush3.msra.mxu0 %v2663_v25 }
 0x4bd   : > { %v2607_v48 = vmul.f32 1.442695, %v2599_v47  ;;  %4039 = vmatprep.subr.mxu0 %v4335_v33  ;;  %v2671_v47 = vld [vmem:[#allocation3 + $0x40] sm:$0xff] }
 0x4bf   : > { %4199 = vpow2.f32 %v2607_v48 }
 0x4c2   : > { %v2580_v49 = vpop.xlane.xlu0 %2579 }
 0x4c3   : > { %v2600_v50 = vsub.f32 %v2096_v5, %v2580_v49  ;;  %v2665_v5 = vld [vmem:[#allocation3 + $0x10] sm:$0xff] }
 0x4c4   : > { %4035 = vmatpush3.msra.mxu1 %v2665_v5 }
 0x4c5   : > { %v2609_v51 = vmul.f32 1.442695, %v2600_v50  ;;  %4046 = vmatprep.subr.mxu1 %v4335_v33  ;;  %v2676_v50 = vld [vmem:[#allocation3 + $0x68] sm:$0xff] }
 0x4c7   : > { %4201 = vpow2.f32 %v2609_v51  ;;  %v2675_v51 = vld [vmem:[#allocation3 + $0x60] sm:$0xff] }
 0x4ca   : > { %v2583_v52 = vpop.xlane.xlu0 %2582 }
 0x4cb   : > { %v2601_v53 = vsub.f32 %v2175_v22, %v2583_v52 }
 0x4cc   : > { %v4887_v54 = vpop.eup %4199 }
 0x4cd   : > { %v2611_v57 = vmul.f32 1.442695, %v2601_v53  ;;  %v2623_v58 = vsel %vm2574_vm5, %v4887_v54, 0.0 }
 0x4ce   : > { %v2589_v59 = vpop.xlane.xlu0 %2588  ;;  %2624 = vadd.xlane.f32.xlu0 %v2623_v58 }
 0x4cf   : > { %4203 = vpow2.f32 %v2611_v57  ;;  %v2603_v61 = vsub.f32 %v2333_v28, %v2589_v59  ;;  %v2674_v57 = vld [vmem:[#allocation3 + $0x58] sm:$0xff] }
 0x4d1   : > { %v2615_v62 = vmul.f32 1.442695, %v2603_v61  ;;  %v2673_v61 = vld [vmem:[#allocation3 + $0x50] sm:$0xff] }
 0x4d2   : > { %v2586_v45 = vpop.xlane.xlu1 %2585  ;;  %v2595_v0 = vpop.xlane.xlu0 %2594 }
 0x4d3   : > { %4205 = vpow2.f32 %v2615_v62  ;;  %v2602_v1 = vsub.f32 %v2254_v41, %v2586_v45  ;;  %v2605_v2 = vsub.f32 %v2491_v29, %v2595_v0  ;;  %v2678_v0 = vld [vmem:[#allocation3 + $0x78] sm:$0xff] }
 0x4d4   : > { %v4891_v60 = vpop.eup %4201 }
 0x4d5   : > { %v2613_v3 = vmul.f32 1.442695, %v2602_v1  ;;  %v2619_v4 = vmul.f32 1.442695, %v2605_v2  ;;  %v2626_v6 = vsel %vm2574_vm5, %v4891_v60, 0.0  ;;  %v2677_v1 = vld [vmem:[#allocation3 + $0x70] sm:$0xff] }
 0x4d6   : > { %2627 = vadd.xlane.f32.xlu1 %v2626_v6 }
 0x4d7   : > { %4207 = vpow2.f32 %v2613_v3 }
 0x4d8   : > { %4209 = vpow2.f32 %v2619_v4 }
 0x4da   : > { %v2592_v7 = vpop.xlane.xlu1 %2591 }
 0x4db   : > { %v2604_v8 = vsub.f32 %v2412_v38, %v2592_v7 }
 0x4dc   : > { %v4895_v9 = vpop.eup %4203 }
 0x4dd   : > { %v2617_v10 = vmul.f32 1.442695, %v2604_v8  ;;  %v2629_v12 = vsel %vm2574_vm5, %v4895_v9, 0.0 }
 0x4de   : > { %2630 = vadd.xlane.f32.xlu0 %v2629_v12 }
 0x4df   : > { %4211 = vpow2.f32 %v2617_v10 }
 0x4e0   : > { %v4899_v13 = vpop.eup %4205 }
 0x4e1   : > { %v2635_v15 = vsel %vm2574_vm5, %v4899_v13, 0.0 }
 0x4e2   : > { %v2598_v55 = vpop.xlane.xlu1 %2597  ;;  %2636 = vadd.xlane.f32.xlu0 %v2635_v15 }
 0x4e3   : > { %v2606_v11 = vsub.f32 %v2570_v35, %v2598_v55 }
 0x4e4   : > { %v4904_v16 = vpop.eup %4207 }
 0x4e5   : > { %v4906_v17 = vpop.eup %4209  ;;  %v2621_v18 = vmul.f32 1.442695, %v2606_v11  ;;  %v2632_v19 = vsel %vm2574_vm5, %v4904_v16, 0.0 }
 0x4e6   : > { %2633 = vadd.xlane.f32.xlu1 %v2632_v19  ;;  %v2641_v23 = vsel %vm2574_vm5, %v4906_v17, 0.0 }
 0x4e7   : > { %4213 = vpow2.f32 %v2621_v18  ;;  %2642 = vadd.xlane.f32.xlu0 %v2641_v23 }
 0x4ec   : > { %v4913_v26 = vpop.eup %4211 }
 0x4ed   : > { %v2638_v28 = vsel %vm2574_vm5, %v4913_v26, 0.0 }
 0x4ee   : > { %2639 = vadd.xlane.f32.xlu1 %v2638_v28 }
 0x4f4   : > { %v4919_v30 = vpop.eup %4213 }
 0x4f5   : > { %v2644_v31 = vsel %vm2574_vm5, %v4919_v30, 0.0 }
 0x4f6   : > { %2645 = vadd.xlane.f32.xlu1 %v2644_v31 }
 0x557   : > { %v2625_v32 = vpop.xlane.xlu0 %2624 }
 0x558   : > { %4215 = vrcp.f32 %v2625_v32 }
 0x55f   : > { %v2628_v22 = vpop.xlane.xlu1 %2627 }
 0x560   : > { %4217 = vrcp.f32 %v2628_v22 }
 0x565   : > { %v4216_v29 = vpop.eup %4215 }
 0x566   : > { %v2648_v34 = vmul.f32 %v4216_v29, %v4887_v54 }
 0x567   : > { %v2631_v39 = vpop.xlane.xlu0 %2630 }
 0x568   : > { %4219 = vrcp.f32 %v2631_v39  ;;  %4030 = vmatmul.mubr.msk.f32.vlgmr.msra.gmra.mxu0 %vm2574_vm5, %v2648_v34 }
 0x569   : > { %4040 = vmatpush3.msra.mxu0 %v2668_v36  ;;  %4043 = vmatprep.mubr.msk.f32.mxu0 %vm4336_vm2, %v4335_v33 }
 0x56a   : > { %4041 = vmatprep.subr.mxu0 %v4335_v33 }
 0x56b   : > { %v2637_v41 = vpop.xlane.xlu0 %2636  ;;  %4042 = vmatpush3.msra.mxu0 %v2667_v40 }
 0x56c   : > { %4221 = vrcp.f32 %v2637_v41  ;;  %4053 = vmatprep.subr.mxu0 %v4335_v33 }
 0x56d   : > { %v4218_v20 = vpop.eup %4217 }
 0x56e   : > { %v2650_v21 = vmul.f32 %v4218_v20, %v4891_v60 }
 0x56f   : > { %v2634_v38 = vpop.xlane.xlu1 %2633 }
 0x570   : > { %4223 = vrcp.f32 %v2634_v38  ;;  %v2643_v42 = vpop.xlane.xlu0 %2642  ;;  %4037 = vmatmul.mubr.msk.f32.vlgmr.msra.gmra.mxu1 %vm2574_vm5, %v2650_v21  ;;  %v3582_v21 = vld [vmem:[%s5106_s3 + $0x38] sm:$0xff] }
 0x571   : > { %4225 = vrcp.f32 %v2643_v42  ;;  %4047 = vmatpush3.msra.mxu1 %v2670_v37  ;;  %4050 = vmatprep.mubr.msk.f32.mxu1 %vm4336_vm2, %v4335_v33  ;;  %v3581_v37 = vld [vmem:[%s5106_s3 + $0x30] sm:$0xff] }
 0x572   : > { %4048 = vmatprep.subr.mxu1 %v4335_v33 }
 0x573   : > { %4049 = vmatpush3.msra.mxu1 %v2669_v43 }
 0x574   : > { %4060 = vmatprep.subr.mxu1 %v4335_v33 }
 0x575   : > { %v4220_v35 = vpop.eup %4219 }
 0x576   : > { %v2652_v24 = vmul.f32 %v4220_v35, %v4895_v9 }
 0x577   : > { %v2640_v46 = vpop.xlane.xlu1 %2639 }
 0x578   : > { %4227 = vrcp.f32 %v2640_v46  ;;  %4044 = vmatmul.mubr.msk.f32.vlgmr.msra.gmra.mxu0 %vm2574_vm5, %v2652_v24  ;;  %v3580_v24 = vld [vmem:[%s5106_s3 + $0x28] sm:$0xff] }
 0x579   : > { %v4222_v48 = vpop.eup %4221  ;;  %4054 = vmatpush3.msra.mxu0 %v2672_v44  ;;  %4057 = vmatprep.mubr.msk.f32.mxu0 %vm4336_vm2, %v4335_v33 }
 0x57a   : > { %4055 = vmatprep.subr.mxu0 %v4335_v33  ;;  %v2656_v49 = vmul.f32 %v4222_v48, %v4899_v13 }
 0x57b   : > { %4056 = vmatpush3.msra.mxu0 %v2671_v47 }
 0x57c   : > { %4058 = vmatmul.mubr.msk.f32.vlgmr.msra.gmra.mxu0 %vm2574_vm5, %v2656_v49  ;;  %4067 = vmatprep.subr.mxu0 %v4335_v33 }
 0x57d   : > { %v4224_v52 = vpop.eup %4223  ;;  %4068 = vmatpush3.msra.mxu0 %v2676_v50  ;;  %4071 = vmatprep.mubr.msk.f32.mxu0 %vm4336_vm2, %v4335_v33 }
 0x57e   : > { %v4226_v53 = vpop.eup %4225  ;;  %4069 = vmatprep.subr.mxu0 %v4335_v33  ;;  %v2654_v54 = vmul.f32 %v4224_v52, %v4904_v16 }
 0x57f   : > { %v2646_v58 = vpop.xlane.xlu1 %2645  ;;  %4070 = vmatpush3.msra.mxu0 %v2675_v51  ;;  %v2660_v59 = vmul.f32 %v4226_v53, %v4906_v17  ;;  %v3579_v51 = vld [vmem:[%s5106_s3 + $0x20] sm:$0xff] }
 0x580   : > { %4229 = vrcp.f32 %v2646_v58  ;;  %4051 = vmatmul.mubr.msk.f32.vlgmr.msra.gmra.mxu1 %vm2574_vm5, %v2654_v54  ;;  %4081 = vmatprep.subr.mxu0 %v4335_v33 }
 0x581   : > { %4072 = vmatmul.mubr.msk.f32.vlgmr.msra.gmra.mxu0 %vm2574_vm5, %v2660_v59  ;;  %4061 = vmatpush3.msra.mxu1 %v2674_v57 }
 0x582   : > { %4062 = vmatprep.subr.mxu1 %v4335_v33  ;;  %4064 = vmatprep.mubr.msk.f32.mxu1 %vm4336_vm2, %v4335_v33 }
 0x583   : > { %4063 = vmatpush3.msra.mxu1 %v2673_v61  ;;  %4097 = vmatprep.mubr.msk.f32.mxu0 %vm4336_vm2, %v4335_v33 }
 0x584   : > { %4074 = vmatprep.subr.mxu1 %v4335_v33  ;;  %4082 = vmatpush3.msra.mxu0 %v3582_v21 }
 0x585   : > { %v4228_v62 = vpop.eup %4227  ;;  %4083 = vmatprep.subr.mxu0 %v4335_v33 }
 0x586   : > { %v2658_v45 = vmul.f32 %v4228_v62, %v4913_v26  ;;  %4084 = vmatpush3.msra.mxu0 %v3581_v37 }
 0x587   : > { %4085 = vmatprep.subr.mxu0 %v4335_v33 }
 0x588   : > { %4065 = vmatmul.mubr.msk.f32.vlgmr.msra.gmra.mxu1 %vm2574_vm5, %v2658_v45  ;;  %4086 = vmatpush3.msra.mxu0 %v3580_v24 }
 0x589   : > { %4075 = vmatpush3.msra.mxu1 %v2678_v0  ;;  %4078 = vmatprep.mubr.msk.f32.mxu1 %vm4336_vm2, %v4335_v33  ;;  %v3578_v0 = vld [vmem:[%s5106_s3 + $0x18] sm:$0xff] }
 0x58a   : > { %4076 = vmatprep.subr.mxu1 %v4335_v33  ;;  %4087 = vmatprep.subr.mxu0 %v4335_v33 }
 0x58b   : > { %4077 = vmatpush3.msra.mxu1 %v2677_v1  ;;  %4088 = vmatpush3.msra.mxu0 %v3579_v51 }
 0x58c   : > { %4089 = vmatprep.subr.mxu0 %v4335_v33 }
 0x58d   : > { %v4230_v2 = vpop.eup %4229  ;;  %4090 = vmatpush3.msra.mxu0 %v3578_v0 }
 0x58e   : > { %v2662_v60 = vmul.f32 %v4230_v2, %v4919_v30  ;;  %4091 = vmatprep.subr.mxu0 %v4335_v33 }
 0x590   : > { %4079 = vmatmul.mubr.msk.f32.vlgmr.msra.gmra.mxu1 %vm2574_vm5, %v2662_v60 }
 0x628   : > { %v2748_v3 = vpop.f32.mrf.mxu0 }
 0x62a   : > { %v4031_v4 = vpop.f32.mrf.mxu0 }
 0x630   : > { %v2821_v6 = vpop.f32.mrf.mxu1 }
 0x632   : > { %v4038_v7 = vpop.f32.mrf.mxu1 }
 0x638   : > { %v2894_v8 = vpop.f32.mrf.mxu0 }
 0x639   : > { %v3263_v13 = vcombine.low %v2748_v3, %v2894_v8  ;;  %v3264_v14 = vcombine.high %v2748_v3, %v2894_v8 }
 0x63a   : > { %v4045_v9 = vpop.f32.mrf.mxu0 }
 0x63b   : > { %v3271_v18 = vrot.slane %v3263_v13, %v4795_v56  ;;  %v3278_v19 = vrot.slane %v3264_v14, %v4795_v56  ;;  %v3577_v13 = vld [vmem:[%s5106_s3 + $0x10] sm:$0xff] }
 0x63c   : > { %v4964_v10 = vpop.f32.mrf.mxu0  ;;  %4092 = vmatpush3.msra.mxu0 %v3577_v13 }
 0x63d   : > { %4093 = vmatprep.subr.mxu0 %v4335_v33 }
 0x63e   : > { %v4059_v12 = vpop.f32.mrf.mxu0 }
 0x640   : > { %v2967_v15 = vpop.f32.mrf.mxu1 }
 0x641   : > { %v3279_v55 = vcombine.low %v2821_v6, %v2967_v15  ;;  %v3280_v11 = vcombine.high %v2821_v6, %v2967_v15  ;;  %v3186_v16 = vpop.f32.mrf.mxu0 }
 0x642   : > { %v4052_v17 = vpop.f32.mrf.mxu1  ;;  %v3295_v49 = vcombine.low %v4964_v10, %v3186_v16  ;;  %v3296_v50 = vcombine.high %v4964_v10, %v3186_v16  ;;  %v3576_v16 = vld [vmem:[%s5106_s3 + $0x8] sm:$0xff] }
 0x643   : > { %v3287_v23 = vrot.slane %v3279_v55, %v4795_v56  ;;  %v3294_v25 = vrot.slane %v3280_v11, %v4795_v56  ;;  %v4073_v26 = vpop.f32.mrf.mxu0  ;;  %4094 = vmatpush3.msra.mxu0 %v3576_v16 }
 0x644   : > { %v3303_v1 = vrot.slane %v3295_v49, %v4795_v56  ;;  %v3310_v3 = vrot.slane %v3296_v50, %v4795_v56  ;;  %4095 = vmatprep.subr.mxu0 %v4335_v33  ;;  %v3847_v50 = vld [vmem:[%s5107_s4] ss:$0 sm:$0xff] }
 0x645   : > { %v3327_v27 = vcombine.low %v3271_v18, %v3287_v23  ;;  %v3328_v5 = vcombine.high %v3271_v18, %v3287_v23  ;;  %v3343_v28 = vcombine.low %v3278_v19, %v3294_v25  ;;  %v3344_v30 = vcombine.high %v3278_v19, %v3294_v25 }
 0x647   : > { %v3335_v31 = vrot.slane %v3327_v27, %v4797_v63  ;;  %v3342_v32 = vrot.slane %v3328_v5, %v4797_v63  ;;  %v3351_v22 = vrot.slane %v3343_v28, %v4797_v63  ;;  %v3358_v29 = vrot.slane %v3344_v30, %v4797_v63  ;;  %v3575_v28 = vld [vmem:[%s5106_s3] sm:$0xff] }
 0x648   : > { %v3113_v34 = vpop.f32.mrf.mxu1  ;;  %4096 = vmatpush3.msra.mxu0 %v3575_v28 }
 0x649   : > { %v3839_v36 = vcombine.low %v3335_v31, %v3342_v32  ;;  %v3841_v39 = vcombine.high %v3335_v31, %v3342_v32  ;;  %v3843_v40 = vcombine.low %v3351_v22, %v3358_v29  ;;  %v3845_v41 = vcombine.high %v3351_v22, %v3358_v29 }
 0x64a   : > { %v4066_v20 = vpop.f32.mrf.mxu1 }
 0x64b   : > { %v3407_v38 = vrot.slane %v3839_v36, %v4795_v56  ;;  %v3423_v42 = vrot.slane %v3841_v39, %v4795_v56  ;;  %v3439_v43 = vrot.slane %v3843_v40, %v4795_v56  ;;  %v3455_v35 = vrot.slane %v3845_v41, %v4795_v56 }
 0x64d   : > { %v3464_v44 = vcombine.high %v3407_v38, %v3423_v42  ;;  %v3496_v46 = vcombine.high %v3439_v43, %v3455_v35  ;;  %v3463_v47 = vcombine.low %v3407_v38, %v3423_v42  ;;  %v3495_v48 = vcombine.low %v3439_v43, %v3455_v35 }
 0x64f   : > { %v3478_v52 = vrot.slane %v3464_v44, %v4797_v63  ;;  %v3510_v53 = vrot.slane %v3496_v46, %v4797_v63  ;;  %v4997_v54 = vrot.slane %v3463_v47, %v4797_v63  ;;  %v5000_v57 = vrot.slane %v3495_v48, %v4797_v63 }
 0x650   : > { %v3259_v58 = vpop.f32.mrf.mxu1 }
 0x651   : > { %v3311_v59 = vcombine.low %v3113_v34, %v3259_v58  ;;  %v3312_v61 = vcombine.high %v3113_v34, %v3259_v58  ;;  %v3529_v62 = vcombine.low %v3478_v52, %v3510_v53  ;;  %v3528_v45 = vcombine.high %v4997_v54, %v5000_v57 }
 0x652   : > { %v4080_v2 = vpop.f32.mrf.mxu1  ;;  %v3527_v60 = vcombine.low %v4997_v54, %v5000_v57  ;;  %v3530_v7 = vcombine.high %v3478_v52, %v3510_v53 }
 0x653   : > { %v3319_v4 = vrot.slane %v3311_v59, %v4795_v56  ;;  %v3326_v6 = vrot.slane %v3312_v61, %v4795_v56  ;;  %3540 = vrot.lane.b32.xlu1 %v3529_v62, %s4346_s8  ;;  %3536 = vrot.lane.b32.xlu0 %v3528_v45, %s4347_s26  ;;  %s4349_s8 = smov 40   ;;  %s4350_s26 = smov 32  }
 0x655   : > { %v3359_v8 = vcombine.low %v3303_v1, %v3319_v4  ;;  %v3360_v9 = vcombine.high %v3303_v1, %v3319_v4  ;;  %v3375_v10 = vcombine.low %v3310_v3, %v3326_v6  ;;  %v3376_v12 = vcombine.high %v3310_v3, %v3326_v6 }
 0x657   : > { %v3367_v14 = vrot.slane %v3359_v8, %v4797_v63  ;;  %v3374_v15 = vrot.slane %v3360_v9, %v4797_v63  ;;  %v3383_v55 = vrot.slane %v3375_v10, %v4797_v63  ;;  %v3390_v11 = vrot.slane %v3376_v12, %v4797_v63  ;;  %3544 = vrot.lane.b32.xlu1 %v3530_v7, %s4348_s14  ;;  %s3850_s14 = sshll.u32 %s4311_s22, 1 }
 0x658   : > { %s3676_s16 = sadd.s32 %s4307_s21, %s3850_s14  ;;  %s3665_s21 = scalar_lea.sflag [#allocation5], %s229_s12 }
 0x659   : > { %v3840_v17 = vcombine.low %v3367_v14, %v3374_v15  ;;  %v3842_v18 = vcombine.high %v3367_v14, %v3374_v15  ;;  %v3844_v19 = vcombine.low %v3383_v55, %v3390_v11  ;;  %v3846_v23 = vcombine.high %v3383_v55, %v3390_v11  ;;  %s3851_s30 = sshll.u32 %s3676_s16, 7  ;;  %s4353_s14 = smov [#allocation4]  }
 0x65a   : > { %s4235_s16 = sshll.u32 %s4353_s14, 4  ;;  %s4236_s16 = int_to_ptr.vmem [resolvable:$false] %s4235_s16 }
 0x65b   : > { %v3414_v25 = vrot.slane %v3840_v17, %v4795_v56  ;;  %v3430_v26 = vrot.slane %v3842_v18, %v4795_v56  ;;  %v3446_v27 = vrot.slane %v3844_v19, %v4795_v56  ;;  %v3462_v5 = vrot.slane %v3846_v23, %v4795_v56  ;;  %s4237_s15 = scalar_lea.vmem %s4236_s16, 256 }
 0x65d   : > { %v3479_v30 = vcombine.low %v3414_v25, %v3430_v26  ;;  %v3511_v31 = vcombine.low %v3446_v27, %v3462_v5  ;;  %v3480_v32 = vcombine.high %v3414_v25, %v3430_v26  ;;  %v3512_v22 = vcombine.high %v3446_v27, %v3462_v5 }
 0x65f   : > { %v3487_v29 = vrot.slane %v3479_v30, %v4797_v63  ;;  %v3519_v34 = vrot.slane %v3511_v31, %v4797_v63  ;;  %v3494_v40 = vrot.slane %v3480_v32, %v4797_v63  ;;  %v3526_v56 = vrot.slane %v3512_v22, %v4797_v63 }
 0x661   : > { %v3532_v36 = vcombine.high %v3487_v29, %v3519_v34  ;;  %v3531_v39 = vcombine.low %v3487_v29, %v3519_v34  ;;  %v3534_v33 = vcombine.high %v3494_v40, %v3526_v56  ;;  %v3533_v41 = vcombine.low %v3494_v40, %v3526_v56 }
 0x663   : > { %3552 = vrot.lane.b32.xlu1 %v3532_v36, %s4349_s8  ;;  %3548 = vrot.lane.b32.xlu0 %v3531_v39, %s4350_s26  ;;  %s3680_s8 = sshll.u32 %s231_s27, 4  ;;  %s3681_s8 = int_to_ptr.vmem [resolvable:$true] %s3680_s8 }
 0x664   : > { %s4231_s22 = scalar_lea.vmem %s3681_s8, 128  ;;  %p4238_p4 = scmp.lt.s32.totalorder %s3681_s8, %s4236_s16 }
 0x665   : > { %p4232_p0 = scmp.ne.s32.totalorder %s3681_s8, %s4231_s22  ;;  %p4239_p5 = scmp.lt.s32.totalorder %s4237_s15, %s4231_s22 }
 0x667   : > { %3560 = vrot.lane.b32.xlu1 %v3534_v33, %s4351_s9  ;;  %3556 = vrot.lane.b32.xlu0 %v3533_v41, %s4352_s10  ;;  %s5052_s10 = scalar_lea.hbm %s5108_s5, %s3851_s30  ;;  %p4233_p1 = pnand %p4232_p0, %p4435_p3 }
 0x668   : > { %p4240_p6 = por %p4239_p5, %p4238_p4 }
 0x669   : > { %p4234_p2 = pneg %p4233_p1 }
 0x66b   : > { %p4241_p7 = pnand %p4240_p6, %p4234_p2 }
 0x6c5   : > { %v3541_v20 = vpop.permute.xlu1 %3540  ;;  %v3537_v21 = vpop.permute.xlu0 %3536 }
 0x6c6   : > { %v3563_v37 = vsel %vm1941_vm4, %v3527_v60, %v3537_v21 }
 0x6c7   : > { %v3564_v63 = vsel %vm2574_vm5, %v3563_v37, %v3541_v20 }
 0x6c9   : > { %v3545_v38 = vpop.permute.xlu1 %3544 }
 0x6ca   : > { %v3566_v42 = vsel %vm3565_vm6, %v3564_v63, %v3545_v38 }
 0x6d5   : > { %v3553_v43 = vpop.permute.xlu1 %3552  ;;  %v3549_v35 = vpop.permute.xlu0 %3548 }
 0x6d6   : > { %v3568_v24 = vsel %vm3567_vm7, %v3566_v42, %v3549_v35 }
 0x6d7   : > { %v3570_v46 = vsel %vm3569_vm8, %v3568_v24, %v3553_v43 }
 0x6d9   : > { %v3561_v44 = vpop.permute.xlu1 %3560  ;;  %v3557_v47 = vpop.permute.xlu0 %3556 }
 0x6da   : > { %v3572_v48 = vsel %vm3571_vm9, %v3570_v46, %v3557_v47 }
 0x6db   : > { %v3574_v49 = vsel %vm3573_vm10, %v3572_v48, %v3561_v44 }
 0x6dc   : > { %4098 = vmatmul.mubr.msk.f32.vlgmr.msra.gmra.mxu0 %vm1557_vm3, %v3574_v49 }
 0x79c   : > { %v3659_v51 = vpop.f32.mrf.mxu0 }
 0x79d   : > { %v3660_v52 = vadd.f32 %v3847_v50, %v3659_v51 }
 0x79e   : > { %v4099_v53 = vpop.f32.mrf.mxu0 }
 0x79f   : > { %3663 = vst.msk [vmem:[%s231_s27] sm:$0xff] %vm1557_vm3, %v3660_v52 }
 0x7a0   : > { %4244 = shalt.err (!%p4241_p7)
}
 0x7a1   : > { %s4245_s13 = scalar_lea.hbm %s5052_s10, 128  ;;  %s4249_s17 = scalar_lea.hbm %s5108_s5, 512 }
 0x7a2   : > { %p4246_p9 = scmp.ne.s32.totalorder %s5052_s10, %s4245_s13  ;;  %p4250_p12 = scmp.lt.s32.totalorder %s5052_s10, %s5108_s5 }
 0x7a3   : > { %p4251_p13 = scmp.lt.s32.totalorder %s4249_s17, %s4245_s13 }
 0x7a4   : > { %p4247_p10 = pnand %p4246_p9, %p4435_p3 }
 0x7a5   : > { %p4252_p0 = por %p4251_p13, %p4250_p12 }
 0x7a6   : > { %p4248_p11 = pneg %p4247_p10 }
 0x7a8   : > { %p4253_p1 = pnand %p4252_p0, %p4248_p11 }
 0x7aa   : > { %4256 = shalt.err (!%p4253_p1)
}
 0x7ab   : > { %4100 = dma.vmem_to_hbm [thread:$0]  (%p4435_p3), %s3681_s8, 128, %s5052_s10, %s3665_s21  }
 0x7ac PF: > { %p4106_p2 = scmp.ge.s32.totalorder %s4323_s25, 2  ;;  %s3692_s9 = sand.u32 1, %s4295_s18  }
 0x7ad   : > { %s3693_s22 = scalar_lea.sflag [#allocation5], %s3692_s9 }
 0x7ae   : > { %p4103_p4 = pnand %p4106_p2, %p4444_p8 }
 0x7b0   : > { %p4104_p5 = pneg %p4103_p4 }
 0x7b2   : > { %4290 = dma.done.wait (%p4104_p5), %s3693_s22, 128  }
 0x7b3   : > { %4292 = vsyncadd (%p4104_p5), %s3693_s22, 4294967168  ;;  %s18_s25 = sadd.s32 1, %s4323_s25   ;;  %s5111_s18 = smov %s4299_s19 }
 0x7b4   : > { %p15_p6 = scmp.ge.s32.totalorder %s18_s25, 6   ;;  %s5112_s19 = smov %s4303_s20 }
 0x7b5   : > { %s5113_s20 = smov %s4453_s11  ;;  %s5114_s21 = smov %s4315_s23 }
 0x7b6   : > { %s5115_s22 = smov %s4319_s24  ;;  %s5116_s23 = smov %s5119_s28 }
 0x7b7   : > { %s5117_s24 = smov %s5123_s29  ;;  %17 = sbr.rel (!%p15_p6) target bundleno = 5 (0x5), region = 80 }
 0x7bc   :  { %3698 = vsyncpa [#allocation5], 1 }
 0x7bd   :  { %3700 = vsyncpa [#allocation5 + $0x1], 1 }

</bundles_post_ra>
